<compile_context>
chip_gen: v6e
topology: v6e:2x2x1
jax: 0.10.0
libtpu: 0.0.40
codegen_flags: <defaults>
</compile_context>

<pallas_src>
import functools

import jax
import jax.numpy as jnp
from jax import lax
from jax.experimental import pallas as pl
from jax.experimental.pallas import tpu as pltpu


# ----------------------------------------------------------------------------
# helpers
# ----------------------------------------------------------------------------
def _round_up(x, m):
    return ((x + m - 1) // m) * m


def _pick_block(dim, pref, align):
    """Largest block <= pref that is a multiple of `align` and divides `dim`.
    `dim` must already be padded to a multiple of `align`."""
    pref = min(pref, dim)
    cand = max(align, (pref // align) * align)
    while dim % cand != 0:
        cand -= align
    return cand


def _default_exp_dtype():
    """bf16 EUP roughly doubles transcendental throughput on v6e/v7x; v5e has
    no bf16 EUP so keep f32 there."""
    try:
        kind = jax.devices()[0].device_kind.lower()
    except Exception:
        return jnp.float32
    if "v6" in kind or "v7" in kind:
        return jnp.bfloat16
    return jnp.float32


# ----------------------------------------------------------------------------
# Pallas kernels
# ----------------------------------------------------------------------------
def _edge_feat_kernel(pos_i_ref, pos_jt_ref, bat_i_ref, bat_j_ref,
                      means_ref, betas_ref, w_ref, b_ref, out_ref,
                      *, cutoff, alpha, exp_dtype):
    """Fused: pairwise distance -> same-molecule mask -> ExpNormalSmearing RBF
    * cosine cutoff -> edge_embedding Linear.

    One grid step handles `rows` complete i-rows of the dense edge set
    (all j lanes, N_pad lane-dense).  Output block is (rows*N_pad, H) bf16."""
    pi = pos_i_ref[...]                                # (rows, 3)  f32
    pjt = pos_jt_ref[...]                              # (3, Np)    f32 (j lane-dense)
    bi = bat_i_ref[...]                                # (rows, 1)  f32
    bj = bat_j_ref[...]                                # (1, Np)    f32
    means = means_ref[...]                             # (R, 1)
    nbetas = -betas_ref[...]                           # (R, 1)  (negate hoisted)
    w = w_ref[...]                                     # (R, H)  bf16
    b = b_ref[...]                                     # (1, H)  f32

    # pairwise distance, pure VPU per-coordinate differences (no HBM round trip)
    dx = pi[:, 0:1] - pjt[0:1, :]
    dy = pi[:, 1:2] - pjt[1:2, :]
    dz = pi[:, 2:3] - pjt[2:3, :]
    d = jnp.sqrt(dx * dx + dy * dy + dz * dz)          # (rows, Np)

    msk = (bi == bj).astype(jnp.float32)               # same-molecule mask
    env = 0.5 * (jnp.cos(d * (jnp.pi / cutoff)) + 1.0)
    env = env * (d < cutoff).astype(jnp.float32) * msk # (rows, Np)
    t = jnp.exp(-alpha * d)                            # (rows, Np)

    rows, npad = d.shape
    for p in range(rows):                              # static unroll (rows == 8)
        t_p = t[p:p + 1, :]                            # (1, Np)
        env_p = env[p:p + 1, :]
        arg = nbetas * (t_p - means) ** 2              # (R, Np)
        if exp_dtype == jnp.bfloat16:
            g = jnp.exp(arg.astype(jnp.bfloat16)).astype(jnp.float32)
        else:
            g = jnp.exp(arg)
        rbf = (env_p * g).astype(jnp.bfloat16)         # (R, Np) bf16 MXU input
        # out[e, h] = sum_r rbf[r, e] * W[r, h]  (transposed-LHS matmul, M = Np)
        out_p = lax.dot_general(rbf, w, (((0,), (0,)), ((), ())),
                                preferred_element_type=jnp.float32) + b
        out_ref[p * npad:(p + 1) * npad, :] = out_p.astype(out_ref.dtype)


def _readout_kernel(x_ref, gamma_ref, beta_ref, w1_ref, b1_ref, w2t_ref,
                    b2_ref, out_ref, *, eps):
    """Fused LayerNorm + (Linear -> SiLU -> Linear(->1)) per-node energy.
    The final width-1 Linear is a VPU multiply + lane reduction."""
    x = x_ref[...].astype(jnp.float32)                 # (tn, H)
    mu = jnp.mean(x, axis=-1, keepdims=True)
    var = jnp.mean((x - mu) ** 2, axis=-1, keepdims=True)   # biased, as torch
    xn = (x - mu) * lax.rsqrt(var + eps)
    xn = xn * gamma_ref[...] + beta_ref[...]
    h = jnp.dot(xn, w1_ref[...], preferred_element_type=jnp.float32) + b1_ref[...]
    h = h * jax.nn.sigmoid(h)                          # SiLU
    out_ref[...] = (jnp.sum(h * w2t_ref[...], axis=-1, keepdims=True)
                    + b2_ref[...])


# ----------------------------------------------------------------------------
# Pallas wrappers
# ----------------------------------------------------------------------------
def edge_features(pos, batch, means_col, betas_col, w, b, *, cutoff, alpha,
                  rows_per_step=8, out_dtype=jnp.bfloat16, exp_dtype=None):
    """Fused edge branch.  pos: [N,3], batch: [N] int.
    Returns dense edge features [N*N, H] (edge e = i*N + j), computed on a
    lane-padded (multiple-of-128) node set; padding is sliced off."""
    if exp_dtype is None:
        exp_dtype = _default_exp_dtype()
    n = pos.shape[0]
    r = means_col.shape[0]
    h = w.shape[1]
    npad = max(_round_up(n, 128), 128)
    rows = rows_per_step                               # 8 sublane rows per step

    pos_p = jnp.zeros((npad, 3), jnp.float32).at[:n].set(pos.astype(jnp.float32))
    bat_p = jnp.full((npad,), -1.0, jnp.float32).at[:n].set(batch.astype(jnp.float32))
    pos_t = pos_p.T                                    # (3, Np), j lane-dense
    bat_col = bat_p.reshape(npad, 1)
    bat_row = bat_p.reshape(1, npad)

    kern = functools.partial(_edge_feat_kernel, cutoff=float(cutoff),
                             alpha=float(alpha), exp_dtype=exp_dtype)
    out = pl.pallas_call(
        kern,
        out_shape=jax.ShapeDtypeStruct((npad * npad, h), out_dtype),
        grid=(npad // rows,),
        in_specs=[
            pl.BlockSpec((rows, 3), lambda i: (i, 0)),
            pl.BlockSpec((3, npad), lambda i: (0, 0)),
            pl.BlockSpec((rows, 1), lambda i: (i, 0)),
            pl.BlockSpec((1, npad), lambda i: (0, 0)),
            pl.BlockSpec((r, 1), lambda i: (0, 0)),
            pl.BlockSpec((r, 1), lambda i: (0, 0)),
            pl.BlockSpec((r, h), lambda i: (0, 0)),
            pl.BlockSpec((1, h), lambda i: (0, 0)),
        ],
        out_specs=pl.BlockSpec((rows * npad, h), lambda i: (i, 0)),
        compiler_params=pltpu.CompilerParams(
            dimension_semantics=("parallel",),
            vmem_limit_bytes=48 * 1024 * 1024),        # safe on v7x's 64 MiB VMEM
    )(pos_p, pos_t, bat_col, bat_row, means_col, betas_col,
      w.astype(jnp.bfloat16), b.astype(jnp.float32))

    out = out.reshape(npad, npad, h)[:n, :n]           # drop lane padding
    return out.reshape(n * n, h)


def readout_energy(x, gamma, beta, w1, b1, w2t, b2, *, eps=1e-5, tile=1024):
    n, hdim = x.shape
    h2 = w1.shape[1]
    npad = max(_round_up(n, 128), 128)                 # pad: no degenerate blocks
    xp = jnp.zeros((npad, hdim), x.dtype).at[:n].set(x)
    tn = _pick_block(npad, tile, 8)
    kern = functools.partial(_readout_kernel, eps=eps)
    out = pl.pallas_call(
        kern,
        out_shape=jax.ShapeDtypeStruct((npad, 1), jnp.float32),
        grid=(npad // tn,),
        in_specs=[
            pl.BlockSpec((tn, hdim), lambda i: (i, 0)),
            pl.BlockSpec((1, hdim), lambda i: (0, 0)),
            pl.BlockSpec((1, hdim), lambda i: (0, 0)),
            pl.BlockSpec((hdim, h2), lambda i: (0, 0)),
            pl.BlockSpec((1, h2), lambda i: (0, 0)),
            pl.BlockSpec((1, h2), lambda i: (0, 0)),
            pl.BlockSpec((1, 1), lambda i: (0, 0)),
        ],
        out_specs=pl.BlockSpec((tn, 1), lambda i: (i, 0)),
        compiler_params=pltpu.CompilerParams(
            dimension_semantics=("parallel",),
            vmem_limit_bytes=32 * 1024 * 1024),
    )(xp, gamma, beta, w1, b1, w2t, b2)
    return out[:n]


# ----------------------------------------------------------------------------
# Model: parameters + forward
# ----------------------------------------------------------------------------
def init_params(key, *, max_z, hidden, num_rbf, cutoff):
    ks = jax.random.split(key, 6)
    h2 = hidden // 2
    start = jnp.exp(jnp.float32(-cutoff))
    params = {
        "embedding": jax.random.normal(ks[0], (max_z, hidden), jnp.float32),
        # ExpNormalSmearing (TorchMD-Net parameterization), column vectors so
        # the edge kernel broadcasts them against lane-dense edge rows.
        "rbf_means": jnp.linspace(start, 1.0, num_rbf,
                                  dtype=jnp.float32).reshape(num_rbf, 1),
        "rbf_betas": jnp.full((num_rbf, 1),
                              (2.0 / num_rbf * (1.0 - start)) ** -2,
                              jnp.float32),
        # edge_embedding: Linear(num_rbf, hidden)
        "edge_w": jax.random.normal(ks[1], (num_rbf, hidden), jnp.float32) * 0.1,
        "edge_b": jnp.zeros((1, hidden), jnp.float32),
        # out_norm: LayerNorm(hidden)
        "ln_gamma": jnp.ones((1, hidden), jnp.float32),
        "ln_beta": jnp.zeros((1, hidden), jnp.float32),
        # readout_energy: Linear(H, H//2) -> SiLU -> Linear(H//2, 1)
        "ro_w1": jax.random.normal(ks[2], (hidden, h2), jnp.float32) * 0.1,
        "ro_b1": jnp.zeros((1, h2), jnp.float32),
        "ro_w2t": jax.random.normal(ks[3], (1, h2), jnp.float32) * 0.1,
        "ro_b2": jnp.zeros((1, 1), jnp.float32),
    }
    return params


def liten_energy(params, z, pos, batch, mean, std, *, num_graphs, cutoff,
                 num_rbf, hidden):
    n = pos.shape[0]
    alpha = 5.0 / cutoff

    # node embedding (glue)
    node_scalar = jnp.take(params["embedding"], z, axis=0)       # [N, H]

    # Fused edge branch.  TODO(synk): stop-gradiented; true forces would need
    # grad through the (undefined) MBI layers, i.e. a Pallas custom VJP here.
    pos_e = lax.stop_gradient(pos)
    edge_feats = edge_features(
        pos_e, batch, params["rbf_means"], params["rbf_betas"],
        params["edge_w"], params["edge_b"], cutoff=cutoff, alpha=alpha)  # [N*N, H] bf16

    node_vector = jnp.zeros((n, 3, hidden), jnp.float32)

    # TODO(synk): MBI interaction stack not provided in the reference source;
    # node_scalar / node_vector / edge_feats pass through unchanged here.
    del edge_feats, node_vector

    # out_norm + readout_energy, fused in one Pallas kernel
    node_energy = readout_energy(
        node_scalar, params["ln_gamma"], params["ln_beta"],
        params["ro_w1"], params["ro_b1"], params["ro_w2t"], params["ro_b2"])  # [N, 1]

    node_energy = node_energy * std
    energy = jax.ops.segment_sum(node_energy[:, 0], batch,
                                 num_segments=num_graphs)        # scatter(sum)
    energy = energy + mean                                       # [B]
    return energy


def liten_forward(params, z, pos, batch, mean, std, *, num_graphs, cutoff,
                  num_rbf, hidden):
    energy_fn = lambda p: liten_energy(params, z, p, batch, mean, std,
                                       num_graphs=num_graphs, cutoff=cutoff,
                                       num_rbf=num_rbf, hidden=hidden)
    energy, pullback = jax.vjp(energy_fn, pos)
    forces = -pullback(jnp.ones_like(energy))[0]                 # -dE/dpos
    return energy, forces


# ----------------------------------------------------------------------------
# Demo
# ----------------------------------------------------------------------------
if __name__ == "__main__":
    # small shapes (production: hidden=256, num_rbf=32, N in the thousands)
    N = 16            # atoms total (2 molecules x 8 atoms)
    HIDDEN = 32
    NUM_RBF = 16
    CUTOFF = 5.0
    MAX_Z = 20
    NUM_GRAPHS = 2

    key = jax.random.PRNGKey(0)
    kz, kp = jax.random.split(key)
    z = jax.random.randint(kz, (N,), 1, MAX_Z, dtype=jnp.int32)
    pos = jax.random.uniform(kp, (N, 3), jnp.float32, minval=0.0, maxval=4.0)
    batch = jnp.concatenate([jnp.zeros(8, jnp.int32), jnp.ones(8, jnp.int32)])
    mean = jnp.float32(0.1)
    std = jnp.float32(1.5)

    params = init_params(jax.random.PRNGKey(42), max_z=MAX_Z, hidden=HIDDEN,
                         num_rbf=NUM_RBF, cutoff=CUTOFF)

    # Exercise the fused edge kernel directly (it is DCE'd inside the jitted
    # energy path because MBI is a pass-through in this reduced model).
    edge_feats = edge_features(pos, batch,
                               params["rbf_means"], params["rbf_betas"],
                               params["edge_w"], params["edge_b"],
                               cutoff=CUTOFF, alpha=5.0 / CUTOFF)
    jax.block_until_ready(edge_feats)
    assert edge_feats.shape == (N * N, HIDDEN)
    assert bool(jnp.all(jnp.isfinite(edge_feats.astype(jnp.float32))))

    fwd = jax.jit(functools.partial(liten_forward, num_graphs=NUM_GRAPHS,
                                    cutoff=CUTOFF, num_rbf=NUM_RBF,
                                    hidden=HIDDEN))
    energy, forces = fwd(params, z, pos, batch, mean, std)
    jax.block_until_ready((energy, forces))

    assert energy.shape == (NUM_GRAPHS,)
    assert forces.shape == (N, 3)
    assert bool(jnp.all(jnp.isfinite(energy))) and bool(jnp.all(jnp.isfinite(forces)))
    print("KERNEL_OK")
</pallas_src>

<mosaic_0001>
module attributes {stable_mosaic.version = 11 : i64} {
  func.func @_edge_feat_kernel(%arg0: i32, %arg1: memref<8x3xf32, #tpu.memory_space<vmem>>, %arg2: memref<3x128xf32, #tpu.memory_space<vmem>>, %arg3: memref<8x1xf32, #tpu.memory_space<vmem>>, %arg4: memref<1x128xf32, #tpu.memory_space<vmem>>, %arg5: memref<16x1xf32, #tpu.memory_space<vmem>>, %arg6: memref<16x1xf32, #tpu.memory_space<vmem>>, %arg7: memref<16x32xbf16, #tpu.memory_space<vmem>>, %arg8: memref<1x32xf32, #tpu.memory_space<vmem>>, %arg9: memref<1024x32xbf16, #tpu.memory_space<vmem>>) attributes {dimension_semantics = [#tpu.dimension_semantics<parallel>], iteration_bounds = array<i64: 16>, scalar_prefetch = 0 : i64, scratch_operands = 0 : i64, tpu.core_type = #tpu.core_type<tc>, window_params = [{transform_indices = @transform_0, window_bounds = array<i64: 8, 3>}, {pipeline_mode = #tpu.pipeline_mode<synchronous>, transform_indices = @transform_1, window_bounds = array<i64: 3, 128>}, {transform_indices = @transform_2, window_bounds = array<i64: 8, 1>}, {pipeline_mode = #tpu.pipeline_mode<synchronous>, transform_indices = @transform_3, window_bounds = array<i64: 1, 128>}, {pipeline_mode = #tpu.pipeline_mode<synchronous>, transform_indices = @transform_4, window_bounds = array<i64: 16, 1>}, {pipeline_mode = #tpu.pipeline_mode<synchronous>, transform_indices = @transform_5, window_bounds = array<i64: 16, 1>}, {pipeline_mode = #tpu.pipeline_mode<synchronous>, transform_indices = @transform_6, window_bounds = array<i64: 16, 32>}, {pipeline_mode = #tpu.pipeline_mode<synchronous>, transform_indices = @transform_7, window_bounds = array<i64: 1, 32>}, {transform_indices = @transform_8, window_bounds = array<i64: 1024, 32>}]} {
    %c0 = arith.constant 0 : index
    %c0_0 = arith.constant 0 : index
    %0 = vector.load %arg1[%c0, %c0_0] : memref<8x3xf32, #tpu.memory_space<vmem>>, vector<8x3xf32>
    %c0_1 = arith.constant 0 : index
    %c0_2 = arith.constant 0 : index
    %1 = vector.load %arg2[%c0_1, %c0_2] : memref<3x128xf32, #tpu.memory_space<vmem>>, vector<3x128xf32>
    %c0_3 = arith.constant 0 : index
    %c0_4 = arith.constant 0 : index
    %2 = vector.load %arg3[%c0_3, %c0_4] : memref<8x1xf32, #tpu.memory_space<vmem>>, vector<8x1xf32>
    %c0_5 = arith.constant 0 : index
    %c0_6 = arith.constant 0 : index
    %3 = vector.load %arg4[%c0_5, %c0_6] : memref<1x128xf32, #tpu.memory_space<vmem>>, vector<1x128xf32>
    %c0_7 = arith.constant 0 : index
    %c0_8 = arith.constant 0 : index
    %4 = vector.load %arg5[%c0_7, %c0_8] : memref<16x1xf32, #tpu.memory_space<vmem>>, vector<16x1xf32>
    %c0_9 = arith.constant 0 : index
    %c0_10 = arith.constant 0 : index
    %5 = vector.load %arg6[%c0_9, %c0_10] : memref<16x1xf32, #tpu.memory_space<vmem>>, vector<16x1xf32>
    %cst = arith.constant 0.000000e+00 : f32
    %6 = vector.broadcast %cst : f32 to vector<16x1xf32>
    %7 = arith.subf %6, %5 : vector<16x1xf32>
    %c0_11 = arith.constant 0 : index
    %c0_12 = arith.constant 0 : index
    %8 = vector.load %arg7[%c0_11, %c0_12] : memref<16x32xbf16, #tpu.memory_space<vmem>>, vector<16x32xbf16>
    %c0_13 = arith.constant 0 : index
    %c0_14 = arith.constant 0 : index
    %9 = vector.load %arg8[%c0_13, %c0_14] : memref<1x32xf32, #tpu.memory_space<vmem>>, vector<1x32xf32>
    %10 = vector.extract_strided_slice %0 {offsets = [0, 0], sizes = [8, 1], strides = [1, 1]} : vector<8x3xf32> to vector<8x1xf32>
    %11 = vector.extract_strided_slice %1 {offsets = [0, 0], sizes = [1, 128], strides = [1, 1]} : vector<3x128xf32> to vector<1x128xf32>
    %12 = vector.broadcast %10 : vector<8x1xf32> to vector<8x128xf32>
    %13 = vector.broadcast %11 : vector<1x128xf32> to vector<8x128xf32>
    %14 = arith.subf %12, %13 : vector<8x128xf32>
    %15 = vector.extract_strided_slice %0 {offsets = [0, 1], sizes = [8, 1], strides = [1, 1]} : vector<8x3xf32> to vector<8x1xf32>
    %16 = vector.extract_strided_slice %1 {offsets = [1, 0], sizes = [1, 128], strides = [1, 1]} : vector<3x128xf32> to vector<1x128xf32>
    %17 = vector.broadcast %15 : vector<8x1xf32> to vector<8x128xf32>
    %18 = vector.broadcast %16 : vector<1x128xf32> to vector<8x128xf32>
    %19 = arith.subf %17, %18 : vector<8x128xf32>
    %20 = vector.extract_strided_slice %0 {offsets = [0, 2], sizes = [8, 1], strides = [1, 1]} : vector<8x3xf32> to vector<8x1xf32>
    %21 = vector.extract_strided_slice %1 {offsets = [2, 0], sizes = [1, 128], strides = [1, 1]} : vector<3x128xf32> to vector<1x128xf32>
    %22 = vector.broadcast %20 : vector<8x1xf32> to vector<8x128xf32>
    %23 = vector.broadcast %21 : vector<1x128xf32> to vector<8x128xf32>
    %24 = arith.subf %22, %23 : vector<8x128xf32>
    %25 = arith.mulf %14, %14 : vector<8x128xf32>
    %26 = arith.mulf %19, %19 : vector<8x128xf32>
    %27 = arith.addf %25, %26 : vector<8x128xf32>
    %28 = arith.mulf %24, %24 : vector<8x128xf32>
    %29 = arith.addf %27, %28 : vector<8x128xf32>
    %30 = math.sqrt %29 : vector<8x128xf32>
    %31 = vector.broadcast %2 : vector<8x1xf32> to vector<8x128xf32>
    %32 = vector.broadcast %3 : vector<1x128xf32> to vector<8x128xf32>
    %33 = arith.cmpf oeq, %31, %32 : vector<8x128xf32>
    %34 = arith.extui %33 : vector<8x128xi1> to vector<8x128xi32>
    %35 = arith.sitofp %34 : vector<8x128xi32> to vector<8x128xf32>
    %cst_15 = arith.constant 0.628318548 : f32
    %36 = vector.broadcast %cst_15 : f32 to vector<8x128xf32>
    %37 = arith.mulf %30, %36 : vector<8x128xf32>
    %38 = math.cos %37 : vector<8x128xf32>
    %cst_16 = arith.constant 1.000000e+00 : f32
    %39 = vector.broadcast %cst_16 : f32 to vector<8x128xf32>
    %40 = arith.addf %38, %39 : vector<8x128xf32>
    %cst_17 = arith.constant 5.000000e-01 : f32
    %41 = vector.broadcast %cst_17 : f32 to vector<8x128xf32>
    %42 = arith.mulf %41, %40 : vector<8x128xf32>
    %cst_18 = arith.constant 5.000000e+00 : f32
    %43 = vector.broadcast %cst_18 : f32 to vector<8x128xf32>
    %44 = arith.cmpf olt, %30, %43 : vector<8x128xf32>
    %45 = arith.extui %44 : vector<8x128xi1> to vector<8x128xi32>
    %46 = arith.sitofp %45 : vector<8x128xi32> to vector<8x128xf32>
    %47 = arith.mulf %42, %46 : vector<8x128xf32>
    %48 = arith.mulf %47, %35 : vector<8x128xf32>
    %cst_19 = arith.constant -1.000000e+00 : f32
    %49 = vector.broadcast %cst_19 : f32 to vector<8x128xf32>
    %50 = arith.mulf %49, %30 : vector<8x128xf32>
    %51 = math.exp %50 : vector<8x128xf32>
    %52 = vector.extract_strided_slice %51 {offsets = [0, 0], sizes = [1, 128], strides = [1, 1]} : vector<8x128xf32> to vector<1x128xf32>
    %53 = vector.extract_strided_slice %48 {offsets = [0, 0], sizes = [1, 128], strides = [1, 1]} : vector<8x128xf32> to vector<1x128xf32>
    %54 = vector.broadcast %52 : vector<1x128xf32> to vector<16x128xf32>
    %55 = vector.broadcast %4 : vector<16x1xf32> to vector<16x128xf32>
    %56 = arith.subf %54, %55 : vector<16x128xf32>
    %57 = arith.mulf %56, %56 : vector<16x128xf32>
    %58 = vector.broadcast %7 : vector<16x1xf32> to vector<16x128xf32>
    %59 = arith.mulf %58, %57 : vector<16x128xf32>
    %60 = math.exp %59 : vector<16x128xf32>
    %61 = vector.broadcast %53 : vector<1x128xf32> to vector<16x128xf32>
    %62 = arith.mulf %61, %60 : vector<16x128xf32>
    %63 = arith.truncf %62 : vector<16x128xf32> to vector<16x128xbf16>
    %cst_20 = arith.constant dense<0.000000e+00> : vector<128x32xf32>
    %64 = tpu.matmul %63, %8, %cst_20 {dimension_numbers = #tpu.dot_dimension_numbers<[0], [0], [1], [1], [0, 1, 1, 1], [], []>} : vector<16x128xbf16>, vector<16x32xbf16>, vector<128x32xf32> -> vector<128x32xf32>
    %65 = vector.broadcast %9 : vector<1x32xf32> to vector<128x32xf32>
    %66 = arith.addf %64, %65 : vector<128x32xf32>
    %67 = arith.truncf %66 : vector<128x32xf32> to vector<128x32xbf16>
    %c0_21 = arith.constant 0 : index
    %c0_22 = arith.constant 0 : index
    %68 = vector.load %arg9[%c0_21, %c0_22] : memref<1024x32xbf16, #tpu.memory_space<vmem>>, vector<128x32xbf16>
    tpu.vector_store %arg9[%c0_21, %c0_22], %67 {strides = array<i32>} : memref<1024x32xbf16, #tpu.memory_space<vmem>>, vector<128x32xbf16>,
    %69 = vector.extract_strided_slice %51 {offsets = [1, 0], sizes = [1, 128], strides = [1, 1]} : vector<8x128xf32> to vector<1x128xf32>
    %70 = vector.extract_strided_slice %48 {offsets = [1, 0], sizes = [1, 128], strides = [1, 1]} : vector<8x128xf32> to vector<1x128xf32>
    %71 = vector.broadcast %69 : vector<1x128xf32> to vector<16x128xf32>
    %72 = vector.broadcast %4 : vector<16x1xf32> to vector<16x128xf32>
    %73 = arith.subf %71, %72 : vector<16x128xf32>
    %74 = arith.mulf %73, %73 : vector<16x128xf32>
    %75 = vector.broadcast %7 : vector<16x1xf32> to vector<16x128xf32>
    %76 = arith.mulf %75, %74 : vector<16x128xf32>
    %77 = math.exp %76 : vector<16x128xf32>
    %78 = vector.broadcast %70 : vector<1x128xf32> to vector<16x128xf32>
    %79 = arith.mulf %78, %77 : vector<16x128xf32>
    %80 = arith.truncf %79 : vector<16x128xf32> to vector<16x128xbf16>
    %cst_23 = arith.constant dense<0.000000e+00> : vector<128x32xf32>
    %81 = tpu.matmul %80, %8, %cst_23 {dimension_numbers = #tpu.dot_dimension_numbers<[0], [0], [1], [1], [0, 1, 1, 1], [], []>} : vector<16x128xbf16>, vector<16x32xbf16>, vector<128x32xf32> -> vector<128x32xf32>
    %82 = vector.broadcast %9 : vector<1x32xf32> to vector<128x32xf32>
    %83 = arith.addf %81, %82 : vector<128x32xf32>
    %84 = arith.truncf %83 : vector<128x32xf32> to vector<128x32xbf16>
    %c128 = arith.constant 128 : index
    %c0_24 = arith.constant 0 : index
    %85 = vector.load %arg9[%c128, %c0_24] : memref<1024x32xbf16, #tpu.memory_space<vmem>>, vector<128x32xbf16>
    tpu.vector_store %arg9[%c128, %c0_24], %84 {strides = array<i32>} : memref<1024x32xbf16, #tpu.memory_space<vmem>>, vector<128x32xbf16>,
    %86 = vector.extract_strided_slice %51 {offsets = [2, 0], sizes = [1, 128], strides = [1, 1]} : vector<8x128xf32> to vector<1x128xf32>
    %87 = vector.extract_strided_slice %48 {offsets = [2, 0], sizes = [1, 128], strides = [1, 1]} : vector<8x128xf32> to vector<1x128xf32>
    %88 = vector.broadcast %86 : vector<1x128xf32> to vector<16x128xf32>
    %89 = vector.broadcast %4 : vector<16x1xf32> to vector<16x128xf32>
    %90 = arith.subf %88, %89 : vector<16x128xf32>
    %91 = arith.mulf %90, %90 : vector<16x128xf32>
    %92 = vector.broadcast %7 : vector<16x1xf32> to vector<16x128xf32>
    %93 = arith.mulf %92, %91 : vector<16x128xf32>
    %94 = math.exp %93 : vector<16x128xf32>
    %95 = vector.broadcast %87 : vector<1x128xf32> to vector<16x128xf32>
    %96 = arith.mulf %95, %94 : vector<16x128xf32>
    %97 = arith.truncf %96 : vector<16x128xf32> to vector<16x128xbf16>
    %cst_25 = arith.constant dense<0.000000e+00> : vector<128x32xf32>
    %98 = tpu.matmul %97, %8, %cst_25 {dimension_numbers = #tpu.dot_dimension_numbers<[0], [0], [1], [1], [0, 1, 1, 1], [], []>} : vector<16x128xbf16>, vector<16x32xbf16>, vector<128x32xf32> -> vector<128x32xf32>
    %99 = vector.broadcast %9 : vector<1x32xf32> to vector<128x32xf32>
    %100 = arith.addf %98, %99 : vector<128x32xf32>
    %101 = arith.truncf %100 : vector<128x32xf32> to vector<128x32xbf16>
    %c256 = arith.constant 256 : index
    %c0_26 = arith.constant 0 : index
    %102 = vector.load %arg9[%c256, %c0_26] : memref<1024x32xbf16, #tpu.memory_space<vmem>>, vector<128x32xbf16>
    tpu.vector_store %arg9[%c256, %c0_26], %101 {strides = array<i32>} : memref<1024x32xbf16, #tpu.memory_space<vmem>>, vector<128x32xbf16>,
    %103 = vector.extract_strided_slice %51 {offsets = [3, 0], sizes = [1, 128], strides = [1, 1]} : vector<8x128xf32> to vector<1x128xf32>
    %104 = vector.extract_strided_slice %48 {offsets = [3, 0], sizes = [1, 128], strides = [1, 1]} : vector<8x128xf32> to vector<1x128xf32>
    %105 = vector.broadcast %103 : vector<1x128xf32> to vector<16x128xf32>
    %106 = vector.broadcast %4 : vector<16x1xf32> to vector<16x128xf32>
    %107 = arith.subf %105, %106 : vector<16x128xf32>
    %108 = arith.mulf %107, %107 : vector<16x128xf32>
    %109 = vector.broadcast %7 : vector<16x1xf32> to vector<16x128xf32>
    %110 = arith.mulf %109, %108 : vector<16x128xf32>
    %111 = math.exp %110 : vector<16x128xf32>
    %112 = vector.broadcast %104 : vector<1x128xf32> to vector<16x128xf32>
    %113 = arith.mulf %112, %111 : vector<16x128xf32>
    %114 = arith.truncf %113 : vector<16x128xf32> to vector<16x128xbf16>
    %cst_27 = arith.constant dense<0.000000e+00> : vector<128x32xf32>
    %115 = tpu.matmul %114, %8, %cst_27 {dimension_numbers = #tpu.dot_dimension_numbers<[0], [0], [1], [1], [0, 1, 1, 1], [], []>} : vector<16x128xbf16>, vector<16x32xbf16>, vector<128x32xf32> -> vector<128x32xf32>
    %116 = vector.broadcast %9 : vector<1x32xf32> to vector<128x32xf32>
    %117 = arith.addf %115, %116 : vector<128x32xf32>
    %118 = arith.truncf %117 : vector<128x32xf32> to vector<128x32xbf16>
    %c384 = arith.constant 384 : index
    %c0_28 = arith.constant 0 : index
    %119 = vector.load %arg9[%c384, %c0_28] : memref<1024x32xbf16, #tpu.memory_space<vmem>>, vector<128x32xbf16>
    tpu.vector_store %arg9[%c384, %c0_28], %118 {strides = array<i32>} : memref<1024x32xbf16, #tpu.memory_space<vmem>>, vector<128x32xbf16>,
    %120 = vector.extract_strided_slice %51 {offsets = [4, 0], sizes = [1, 128], strides = [1, 1]} : vector<8x128xf32> to vector<1x128xf32>
    %121 = vector.extract_strided_slice %48 {offsets = [4, 0], sizes = [1, 128], strides = [1, 1]} : vector<8x128xf32> to vector<1x128xf32>
    %122 = vector.broadcast %120 : vector<1x128xf32> to vector<16x128xf32>
    %123 = vector.broadcast %4 : vector<16x1xf32> to vector<16x128xf32>
    %124 = arith.subf %122, %123 : vector<16x128xf32>
    %125 = arith.mulf %124, %124 : vector<16x128xf32>
    %126 = vector.broadcast %7 : vector<16x1xf32> to vector<16x128xf32>
    %127 = arith.mulf %126, %125 : vector<16x128xf32>
    %128 = math.exp %127 : vector<16x128xf32>
    %129 = vector.broadcast %121 : vector<1x128xf32> to vector<16x128xf32>
    %130 = arith.mulf %129, %128 : vector<16x128xf32>
    %131 = arith.truncf %130 : vector<16x128xf32> to vector<16x128xbf16>
    %cst_29 = arith.constant dense<0.000000e+00> : vector<128x32xf32>
    %132 = tpu.matmul %131, %8, %cst_29 {dimension_numbers = #tpu.dot_dimension_numbers<[0], [0], [1], [1], [0, 1, 1, 1], [], []>} : vector<16x128xbf16>, vector<16x32xbf16>, vector<128x32xf32> -> vector<128x32xf32>
    %133 = vector.broadcast %9 : vector<1x32xf32> to vector<128x32xf32>
    %134 = arith.addf %132, %133 : vector<128x32xf32>
    %135 = arith.truncf %134 : vector<128x32xf32> to vector<128x32xbf16>
    %c512 = arith.constant 512 : index
    %c0_30 = arith.constant 0 : index
    %136 = vector.load %arg9[%c512, %c0_30] : memref<1024x32xbf16, #tpu.memory_space<vmem>>, vector<128x32xbf16>
    tpu.vector_store %arg9[%c512, %c0_30], %135 {strides = array<i32>} : memref<1024x32xbf16, #tpu.memory_space<vmem>>, vector<128x32xbf16>,
    %137 = vector.extract_strided_slice %51 {offsets = [5, 0], sizes = [1, 128], strides = [1, 1]} : vector<8x128xf32> to vector<1x128xf32>
    %138 = vector.extract_strided_slice %48 {offsets = [5, 0], sizes = [1, 128], strides = [1, 1]} : vector<8x128xf32> to vector<1x128xf32>
    %139 = vector.broadcast %137 : vector<1x128xf32> to vector<16x128xf32>
    %140 = vector.broadcast %4 : vector<16x1xf32> to vector<16x128xf32>
    %141 = arith.subf %139, %140 : vector<16x128xf32>
    %142 = arith.mulf %141, %141 : vector<16x128xf32>
    %143 = vector.broadcast %7 : vector<16x1xf32> to vector<16x128xf32>
    %144 = arith.mulf %143, %142 : vector<16x128xf32>
    %145 = math.exp %144 : vector<16x128xf32>
    %146 = vector.broadcast %138 : vector<1x128xf32> to vector<16x128xf32>
    %147 = arith.mulf %146, %145 : vector<16x128xf32>
    %148 = arith.truncf %147 : vector<16x128xf32> to vector<16x128xbf16>
    %cst_31 = arith.constant dense<0.000000e+00> : vector<128x32xf32>
    %149 = tpu.matmul %148, %8, %cst_31 {dimension_numbers = #tpu.dot_dimension_numbers<[0], [0], [1], [1], [0, 1, 1, 1], [], []>} : vector<16x128xbf16>, vector<16x32xbf16>, vector<128x32xf32> -> vector<128x32xf32>
    %150 = vector.broadcast %9 : vector<1x32xf32> to vector<128x32xf32>
    %151 = arith.addf %149, %150 : vector<128x32xf32>
    %152 = arith.truncf %151 : vector<128x32xf32> to vector<128x32xbf16>
    %c640 = arith.constant 640 : index
    %c0_32 = arith.constant 0 : index
    %153 = vector.load %arg9[%c640, %c0_32] : memref<1024x32xbf16, #tpu.memory_space<vmem>>, vector<128x32xbf16>
    tpu.vector_store %arg9[%c640, %c0_32], %152 {strides = array<i32>} : memref<1024x32xbf16, #tpu.memory_space<vmem>>, vector<128x32xbf16>,
    %154 = vector.extract_strided_slice %51 {offsets = [6, 0], sizes = [1, 128], strides = [1, 1]} : vector<8x128xf32> to vector<1x128xf32>
    %155 = vector.extract_strided_slice %48 {offsets = [6, 0], sizes = [1, 128], strides = [1, 1]} : vector<8x128xf32> to vector<1x128xf32>
    %156 = vector.broadcast %154 : vector<1x128xf32> to vector<16x128xf32>
    %157 = vector.broadcast %4 : vector<16x1xf32> to vector<16x128xf32>
    %158 = arith.subf %156, %157 : vector<16x128xf32>
    %159 = arith.mulf %158, %158 : vector<16x128xf32>
    %160 = vector.broadcast %7 : vector<16x1xf32> to vector<16x128xf32>
    %161 = arith.mulf %160, %159 : vector<16x128xf32>
    %162 = math.exp %161 : vector<16x128xf32>
    %163 = vector.broadcast %155 : vector<1x128xf32> to vector<16x128xf32>
    %164 = arith.mulf %163, %162 : vector<16x128xf32>
    %165 = arith.truncf %164 : vector<16x128xf32> to vector<16x128xbf16>
    %cst_33 = arith.constant dense<0.000000e+00> : vector<128x32xf32>
    %166 = tpu.matmul %165, %8, %cst_33 {dimension_numbers = #tpu.dot_dimension_numbers<[0], [0], [1], [1], [0, 1, 1, 1], [], []>} : vector<16x128xbf16>, vector<16x32xbf16>, vector<128x32xf32> -> vector<128x32xf32>
    %167 = vector.broadcast %9 : vector<1x32xf32> to vector<128x32xf32>
    %168 = arith.addf %166, %167 : vector<128x32xf32>
    %169 = arith.truncf %168 : vector<128x32xf32> to vector<128x32xbf16>
    %c768 = arith.constant 768 : index
    %c0_34 = arith.constant 0 : index
    %170 = vector.load %arg9[%c768, %c0_34] : memref<1024x32xbf16, #tpu.memory_space<vmem>>, vector<128x32xbf16>
    tpu.vector_store %arg9[%c768, %c0_34], %169 {strides = array<i32>} : memref<1024x32xbf16, #tpu.memory_space<vmem>>, vector<128x32xbf16>,
    %171 = vector.extract_strided_slice %51 {offsets = [7, 0], sizes = [1, 128], strides = [1, 1]} : vector<8x128xf32> to vector<1x128xf32>
    %172 = vector.extract_strided_slice %48 {offsets = [7, 0], sizes = [1, 128], strides = [1, 1]} : vector<8x128xf32> to vector<1x128xf32>
    %173 = vector.broadcast %171 : vector<1x128xf32> to vector<16x128xf32>
    %174 = vector.broadcast %4 : vector<16x1xf32> to vector<16x128xf32>
    %175 = arith.subf %173, %174 : vector<16x128xf32>
    %176 = arith.mulf %175, %175 : vector<16x128xf32>
    %177 = vector.broadcast %7 : vector<16x1xf32> to vector<16x128xf32>
    %178 = arith.mulf %177, %176 : vector<16x128xf32>
    %179 = math.exp %178 : vector<16x128xf32>
    %180 = vector.broadcast %172 : vector<1x128xf32> to vector<16x128xf32>
    %181 = arith.mulf %180, %179 : vector<16x128xf32>
    %182 = arith.truncf %181 : vector<16x128xf32> to vector<16x128xbf16>
    %cst_35 = arith.constant dense<0.000000e+00> : vector<128x32xf32>
    %183 = tpu.matmul %182, %8, %cst_35 {dimension_numbers = #tpu.dot_dimension_numbers<[0], [0], [1], [1], [0, 1, 1, 1], [], []>} : vector<16x128xbf16>, vector<16x32xbf16>, vector<128x32xf32> -> vector<128x32xf32>
    %184 = vector.broadcast %9 : vector<1x32xf32> to vector<128x32xf32>
    %185 = arith.addf %183, %184 : vector<128x32xf32>
    %186 = arith.truncf %185 : vector<128x32xf32> to vector<128x32xbf16>
    %c896 = arith.constant 896 : index
    %c0_36 = arith.constant 0 : index
    %187 = vector.load %arg9[%c896, %c0_36] : memref<1024x32xbf16, #tpu.memory_space<vmem>>, vector<128x32xbf16>
    tpu.vector_store %arg9[%c896, %c0_36], %186 {strides = array<i32>} : memref<1024x32xbf16, #tpu.memory_space<vmem>>, vector<128x32xbf16>,
    return
  }
  func.func @transform_0(%arg0: i32) -> (i32, i32) {
    %c0_i32 = arith.constant 0 : i32
    %c0_i32_0 = arith.constant 0 : i32
    return %arg0, %c0_i32 : i32, i32
  }
  func.func @transform_1(%arg0: i32) -> (i32, i32) {
    %c0_i32 = arith.constant 0 : i32
    %c0_i32_0 = arith.constant 0 : i32
    %c0_i32_1 = arith.constant 0 : i32
    return %c0_i32, %c0_i32_0 : i32, i32
  }
  func.func @transform_2(%arg0: i32) -> (i32, i32) {
    %c0_i32 = arith.constant 0 : i32
    %c0_i32_0 = arith.constant 0 : i32
    return %arg0, %c0_i32 : i32, i32
  }
  func.func @transform_3(%arg0: i32) -> (i32, i32) {
    %c0_i32 = arith.constant 0 : i32
    %c0_i32_0 = arith.constant 0 : i32
    %c0_i32_1 = arith.constant 0 : i32
    return %c0_i32, %c0_i32_0 : i32, i32
  }
  func.func @transform_4(%arg0: i32) -> (i32, i32) {
    %c0_i32 = arith.constant 0 : i32
    %c0_i32_0 = arith.constant 0 : i32
    %c0_i32_1 = arith.constant 0 : i32
    return %c0_i32, %c0_i32_0 : i32, i32
  }
  func.func @transform_5(%arg0: i32) -> (i32, i32) {
    %c0_i32 = arith.constant 0 : i32
    %c0_i32_0 = arith.constant 0 : i32
    %c0_i32_1 = arith.constant 0 : i32
    return %c0_i32, %c0_i32_0 : i32, i32
  }
  func.func @transform_6(%arg0: i32) -> (i32, i32) {
    %c0_i32 = arith.constant 0 : i32
    %c0_i32_0 = arith.constant 0 : i32
    %c0_i32_1 = arith.constant 0 : i32
    return %c0_i32, %c0_i32_0 : i32, i32
  }
  func.func @transform_7(%arg0: i32) -> (i32, i32) {
    %c0_i32 = arith.constant 0 : i32
    %c0_i32_0 = arith.constant 0 : i32
    %c0_i32_1 = arith.constant 0 : i32
    return %c0_i32, %c0_i32_0 : i32, i32
  }
  func.func @transform_8(%arg0: i32) -> (i32, i32) {
    %c0_i32 = arith.constant 0 : i32
    %c0_i32_0 = arith.constant 0 : i32
    return %arg0, %c0_i32 : i32, i32
  }
}

</mosaic_0001>

<bundles_post_ra>
// kernel: tpu_custom_call.1
= control target key start
LH: loop header
LB: loop body
LE: loop exit
PB: predicated region body
PF: predicated region fallthrough
CT: control target
= control target key end

     0   :  { %13 = vsyncpa [#allocation3], 0  ;;  %s4189_s0 = inlined_call_operand.vmem [shape: f32[128,3], index: 0, kind: input, shape index: {}]   ;;  %s4190_s1 = inlined_call_operand.hbm [shape: f32[3,128], index: 1, kind: input, shape index: {}]   ;;  %s4191_s2 = inlined_call_operand.vmem [shape: f32[128,1], index: 2, kind: input, shape index: {}]   ;;  %s4192_s3 = inlined_call_operand.hbm [shape: f32[1,128], index: 3, kind: input, shape index: {}]   ;;  %s4193_s4 = inlined_call_operand.vmem [shape: f32[16,1], index: 4, kind: input, shape index: {}]   ;;  %s4194_s5 = inlined_call_operand.vmem [shape: f32[16,1], index: 5, kind: input, shape index: {}]   ;;  %s4195_s6 = inlined_call_operand.hbm [shape: bf16[16,32], index: 6, kind: input, shape index: {}]   ;;  %s4196_s7 = inlined_call_operand.hbm [shape: f32[1,32], index: 7, kind: input, shape index: {}]   ;;  %s4197_s8 = inlined_call_operand.vmem [shape: bf16[16384,32], index: 8, kind: output, shape index: {}]  }
   0x1   :  { %14 = vsyncpa [#allocation5], 0 }
   0x2   :  { %15 = vsyncpa [#allocation8], 0  ;;  %s3463_s27 = smov 0  }
   0x3 LB: > { %s3402_s28 = smov [#allocation4]   ;;  %s3469_s30 = sadd.s32 4294967295, %s3400_s27   ;;  %s3400_s27 = sphi %s3463_s27, %s21_s27  }
   0x4   : > { %s254_s29 = sshll.u32 %s3402_s28, 4  ;;  %p2605_p0 = scmp.ge.s32.totalorder %s3400_s27, 1  ;;  %s255_s29 = int_to_ptr.vmem [resolvable:$true] %s254_s29 }
   0x5   : > { %p230_p1 = scmp.lt.s32.totalorder %s3400_s27, 17  ;;  %p4198_p2 = scmp.eq.s32.totalorder %s3469_s30, 0 }
   0x6   : > { %s3403_s10 = smov [#allocation2]   ;;  %s3404_s12 = smov [#allocation6]  }
   0x7   : > { %p3474_p3 = pnand %p2605_p0, %p230_p1  ;;  %s243_s11 = sshll.u32 %s3403_s10, 4  ;;  %s244_s11 = int_to_ptr.vmem [resolvable:$true] %s243_s11 }
   0x8   : > { %s270_s13 = sshll.u32 %s3404_s12, 4  ;;  %s3405_s15 = smov [#allocation7]   ;;  %s3486_s13 = int_to_ptr.vmem [resolvable:$true] %s270_s13 }
   0x9   : > { %s4200_s9 = scalar_select %p3474_p3, 1, 0 }
   0xa   : > { %p3187_p4 = pneg %p3474_p3  ;;  %s3488_s16 = sshll.u32 %s3405_s15, 4  ;;  %s285_s16 = int_to_ptr.vmem [resolvable:$true] %s3488_s16 }
   0xb   : > { %s3289_s17 = scalar_lea.vmem %s255_s29, 16  ;;  %s3296_s18 = scalar_lea.vmem %s255_s29, 32 }
   0xc   : > { %p3482_p5 = pnand %p4198_p2, %p3187_p4  ;;  %p3290_p7 = scmp.ne.s32.totalorder %s255_s29, %s3289_s17 }
   0xd   : > { %p3297_p10 = scmp.lt.s32.totalorder %s255_s29, %s255_s29  ;;  %p3298_p11 = scmp.lt.s32.totalorder %s3296_s18, %s3289_s17 }
   0xe   : > { %p3280_p6 = pneg %p3482_p5 }
   0xf   : > { %p3299_p12 = por %p3298_p11, %p3297_p10 }
  0x10   : > { %p3292_p8 = pnand %p3290_p7, %p3280_p6 }
  0x12   : > { %p3293_p9 = pneg %p3292_p8 }
  0x14   : > { %p3300_p13 = pnand %p3299_p12, %p3293_p9 }
  0x16   : > { %3303 = shalt.err (!%p3300_p13)
}
  0x17   : > { %3193 = dma.hbm_to_vmem [thread:$0]  (!%p3482_p5), %s4192_s3, 16, %s255_s29, [#allocation5]  }
  0x18   : > { %s3315_s21 = scalar_lea.vmem %s244_s11, 64  ;;  %p3323_p7 = scmp.lt.s32.totalorder %s244_s11, %s244_s11 }
  0x19   : > { %p3316_p0 = scmp.ne.s32.totalorder %s244_s11, %s3315_s21  ;;  %p3324_p8 = scmp.lt.s32.totalorder %s3315_s21, %s3315_s21 }
  0x1b   : > { %p3318_p1 = pnand %p3316_p0, %p3280_p6  ;;  %p3325_p2 = por %p3324_p8, %p3323_p7 }
  0x1d   : > { %p3319_p4 = pneg %p3318_p1 }
  0x1f   : > { %p3326_p3 = pnand %p3325_p2, %p3319_p4 }
  0x21   : > { %3329 = shalt.err (!%p3326_p3)
}
  0x22   : > { %3190 = dma.hbm_to_vmem [thread:$0]  (!%p3482_p5), %s4190_s1, 64, %s244_s11, [#allocation3]  }
  0x23   : > { %s3341_s24 = scalar_lea.vmem %s3486_s13, 128  ;;  %p3349_p12 = scmp.lt.s32.totalorder %s3486_s13, %s3486_s13 }
  0x24   : > { %p3342_p9 = scmp.ne.s32.totalorder %s3486_s13, %s3341_s24  ;;  %p3350_p2 = scmp.lt.s32.totalorder %s3341_s24, %s3341_s24 }
  0x26   : > { %p3344_p10 = pnand %p3342_p9, %p3280_p6  ;;  %p3351_p3 = por %p3350_p2, %p3349_p12 }
  0x28   : > { %p3345_p11 = pneg %p3344_p10 }
  0x2a   : > { %p3352_p13 = pnand %p3351_p3, %p3345_p11 }
  0x2c   : > { %3355 = shalt.err (!%p3352_p13)
}
  0x2d   : > { %s3406_s25 = smov 64   ;;  %s3407_s26 = smov 4  }
  0x2e   : > { %3196 = dma.hbm_to_vmem [thread:$0]  (!%p3482_p5), %s4195_s6, 128, %s3486_s13, [#allocation5], %s3406_s25, %s3406_s25, %s3407_s26  }
  0x2f   : > { %s3367_s10 = scalar_lea.vmem %s285_s16, 16  ;;  %s3374_s11 = scalar_lea.vmem %s285_s16, 32 }
  0x30   : > { %p3368_p0 = scmp.ne.s32.totalorder %s285_s16, %s3367_s10  ;;  %p3375_p7 = scmp.lt.s32.totalorder %s285_s16, %s285_s16 }
  0x31   : > { %p3376_p8 = scmp.lt.s32.totalorder %s3374_s11, %s3367_s10 }
  0x32   : > { %p3370_p1 = pnand %p3368_p0, %p3280_p6 }
  0x33   : > { %p3377_p9 = por %p3376_p8, %p3375_p7 }
  0x34   : > { %p3371_p4 = pneg %p3370_p1 }
  0x36   : > { %p3378_p10 = pnand %p3377_p9, %p3371_p4 }
  0x38   : > { %3381 = shalt.err (!%p3378_p10)
}
  0x39   : > { %3199 = dma.hbm_to_vmem [thread:$0]  (!%p3482_p5), %s4196_s7, 16, %s285_s16, [#allocation8]  }
  0x3a   : > { %p4202_p11 = scmp.ne.s32.totalorder %s4200_s9, 0 }
  0x3b   : > { %p4203_p12 = scmp.eq.s32.totalorder (!%p4202_p11), %s3469_s30, 0 }
  0x3c   : > { %311 = sbr.rel (%p4202_p11) target bundleno = 760 (0x2f8), region = 52 }
  0x41   : > { %3387 = dma.done.wait (%p4203_p12), [#allocation3], 64   ;;  %p4204_p6 = pmov %p4203_p12 }
  0x43   : > { %3389 = vsyncadd (%p4204_p6), [#allocation3], 4294967232  ;;  %p4205_p2 = pmov %p4204_p6 }
  0x45   : > { %3391 = dma.done.wait (%p4205_p2), [#allocation5], 144   ;;  %p4206_p3 = pmov %p4205_p2 }
  0x46   : > { %p4207_p13 = pmov %p4205_p2 }
  0x47   : > { %3393 = vsyncadd (%p4206_p3), [#allocation5], 4294967152 }
  0x48   : > { %3395 = dma.done.wait (%p4207_p13), [#allocation8], 16   ;;  %p4208_p5 = pmov %p4205_p2 }
  0x49   : > { %p360_p0 = scmp.lt.s32.totalorder %s3469_s30, 15  ;;  %v3408_v0 = vmov 0   ;;  %v3409_v1 = vmov 2   ;;  %v379_v3 = vld [vmem:[%s4193_s4] sm:$0xff]  ;;  %v3410_v5 = vmov 1   ;;  %v380_v6 = vld [vmem:[%s4193_s4 + $0x8] sm:$0xff]  ;;  %v393_v11 = vlaneseq }
  0x4a   : > { %3397 = vsyncadd (%p4208_p5), [#allocation8], 4294967280  ;;  %3232 = vset.pattern.permute.xlu0 %v3408_v0  ;;  %3234 = vset.pattern.permute.xlu1 %v3409_v1  ;;  %v381_v4 = vld [vmem:[%s4194_s5] sm:$0xff]  ;;  %v382_v7 = vld [vmem:[%s4194_s5 + $0x8] sm:$0xff]  ;;  %v3411_v47 = vmov 683565275  }
  0x4b   : > { %s361_s9 = scalar_select %p360_p0, %s3469_s30, 15  ;;  %v383_v8 = vsub.f32 0.0, %v381_v4  ;;  %v384_v9 = vsub.f32 0.0, %v382_v7  ;;  %v3564_v12 = vshrl.u32 %v393_v11, 7  ;;  %v376_v15 = vld [vmem:[#allocation2] sm:$0x7] }
  0x4c   : > { %v3412_v49 = vmov 2475754826   ;;  %v3413_v53 = vmov 2131351028   ;;  %v3414_v56 = vmov 2102212464  }
  0x4d   : > { %s2616_s13 = sshll.u32 %s361_s9, 3  ;;  %v3567_v13 = vsub.s32 0, %v3564_v12  ;;  %v3570_v14 = vsub.s32 2, %v3564_v12  ;;  %v3573_v16 = vsub.s32 1, %v3564_v12  ;;  %v3415_v59 = vmov 920167782  }
  0x4e   : > { %s363_s17 = scalar_lea.vmem %s4189_s0, %s2616_s13  ;;  %s367_s29 = scalar_lea.vmem %s4191_s2, %s2616_s13  ;;  %v3416_v62 = vmov 1326507024  }
  0x4f   : > { %v375_v2 = vld [vmem:[%s363_s17] sm:$0xff]  ;;  %v396_v17 = vrot.slane %v376_v15, %v3567_v13  ;;  %v414_v19 = vrot.slane %v376_v15, %v3570_v14  ;;  %v405_v21 = vrot.slane %v376_v15, %v3573_v16  ;;  %s2618_s10 = sshll.u32 %s3469_s30, 7 }
  0x50   : > { %390 = vperm.xlu0 %3232, %v375_v2   ;;  %408 = vperm.xlu1 %3234, %v375_v2   ;;  %v377_v10 = vld [vmem:[%s367_s29] sm:$0xff]  ;;  %p369_p1 = scmp.lt.s32.totalorder %s2618_s10, 2047 }
  0x52   : > { %s4212_s10 = smov (!%p369_p1, %s2618_s10), 2047 }
  0x53   : > { %s2619_s11 = sshll.u32 %s4212_s10, 2 }
  0x54   : > { %3233 = vset.pattern.permute.xlu0 %v3410_v5  ;;  %3235 = vset.pattern.permute.xlu1 %v3408_v0  ;;  %s3802_s9 = scalar_lea.vmem %s4197_s8, %s2619_s11 }
  0x55   : > { %399 = vperm.xlu0 %3233, %v375_v2   ;;  %562 = vperm.xlu1 %3235, %v379_v3  }
  0x59   : > { %567 = vperm.xlu1 %3235, %v380_v6   ;;  %3236 = vset.pattern.permute.xlu0 %v3408_v0 }
  0x5a   : > { %576 = vperm.xlu0 %3236, %v383_v8  }
  0x5d   : > { %581 = vperm.xlu1 %3235, %v384_v9  }
  0x61   : > { %430 = vperm.xlu1 %3235, %v377_v10  }
  0xcb   : > { %v391_v18 = vpop.permute.xlu0 %390  ;;  %v409_v20 = vpop.permute.xlu1 %408 }
  0xcc   : > { %v397_v22 = vsub.f32 %v391_v18, %v396_v17  ;;  %v415_v23 = vsub.f32 %v409_v20, %v414_v19 }
  0xce   : > { %v416_v26 = vmul.f32 %v397_v22, %v397_v22  ;;  %v419_v28 = vmul.f32 %v415_v23, %v415_v23 }
  0xd0   : > { %v400_v24 = vpop.permute.xlu0 %399 }
  0xd1   : > { %v406_v25 = vsub.f32 %v400_v24, %v405_v21 }
  0xd3   : > { %v417_v27 = vmul.f32 %v406_v25, %v406_v25 }
  0xd5   : > { %v418_v29 = vadd.f32 %v417_v27, %v416_v26 }
  0xd7   : > { %v420_v30 = vadd.f32 %v419_v28, %v418_v29 }
  0xd9   : > { %3238 = vrsqrt.f32 %v420_v30  ;;  %vm423_vm0 = vcmp.eq.f32.partialorder %v420_v30, inf  ;;  %v426_v33 = vand.u32 2147483648, %v420_v30  ;;  %vm425_vm1 = vcmp.eq.f32.partialorder %v420_v30, 0.0 }
  0xe6   : > { %v3239_v31 = vpop.eup %3238 }
  0xe7   : > { %v422_v32 = vmul.f32 %v3239_v31, %v420_v30 }
  0xe9   : > { %v424_v34 = vsel %vm423_vm0, %v420_v30, %v422_v32 }
  0xea   : > { %v3578_v35 = vsel %vm425_vm1, %v426_v33, %v424_v34  ;;  %v3597_v33 = vpop.permute.xlu1 %562  ;;  %vm625_vm1 = vcmask 130048  }
  0xeb   : > { %v3581_v36 = vmul.f32 0.62831855, %v3578_v35  ;;  %v553_v51 = vmul.f32 -1.0, %v3578_v35  ;;  %vm548_vm15 = vcmp.lt.f32.partialorder %v3578_v35, 5.0 }
  0xed   : > { %v446_v37 = vand.u32 2139095040, %v3581_v36  ;;  %v443_v41 = vand.u32 2147483647, %v3581_v36  ;;  %v554_v9 = vmul.f32 1.442695, %v553_v51  ;;  %vm445_vm9 = vcmp.lt.s32.totalorder %v3581_v36, 0 }
  0xee   : > { %vm535_vm14 = vweird.f32 %v3581_v36 }
  0xef   : > { %v447_v38 = vshrl.u32 %v446_v37, 23  ;;  %v450_v44 = vand.u32 8388607, %v443_v41  ;;  %3240 = vpow2.f32 %v554_v9  ;;  %v1544_v9 = vsub.s32 4, %v3564_v12 }
  0xf0   : > { %vm3655_vm10 = vcmp.le.f32.partialorder %v443_v41, 0.7853982 }
  0xf1   : > { %v2622_v39 = vadd.s32 4294967169, %v447_v38  ;;  %v451_v0 = vor.u32 8388608, %v450_v44 }
  0xf3   : > { %v453_v40 = vadd.s32 1, %v2622_v39  ;;  %v491_v19 = vshll.u32 %v451_v0, 8  ;;  %v2258_v39 = vsub.s32 7, %v3564_v12 }
  0xf5   : > { %vm454_vm2 = vcmp.gt.s32.totalorder %v453_v40, 0 }
  0xf6   : > { %v455_v42 = vsel %vm454_vm2, %v453_v40, 0  ;;  %v2020_v40 = vsub.s32 6, %v3564_v12  ;;  %vm811_vm2 = vcmask 257024  }
  0xf7   : > { %v457_v43 = vand.u32 31, %v455_v42  ;;  %v456_v46 = vshrl.u32 %v455_v42, 5 }
  0xf9   : > { %v458_v45 = vsub.s32 32, %v457_v43  ;;  %v460_v48 = vshll.u32 %v3411_v47, %v457_v43  ;;  %v463_v50 = vshll.u32 %v3412_v49, %v457_v43  ;;  %v466_v55 = vshll.u32 %v3413_v53, %v457_v43 }
  0xfa   : > { %v469_v58 = vshll.u32 %v3414_v56, %v457_v43  ;;  %v472_v61 = vshll.u32 %v3415_v59, %v457_v43  ;;  %vm475_vm3 = vcmp.lt.s32.totalorder %v456_v46, 1  ;;  %vm478_vm4 = vcmp.lt.s32.totalorder %v456_v46, 4  ;;  %v3606_v43 = vpop.permute.xlu1 %567 }
  0xfb   : > { %v461_v52 = vshrl.u32 %v3412_v49, %v458_v45  ;;  %v464_v54 = vshrl.u32 %v3413_v53, %v458_v45  ;;  %v467_v57 = vshrl.u32 %v3414_v56, %v458_v45  ;;  %v470_v60 = vshrl.u32 %v3415_v59, %v458_v45 }
  0xfc   : > { %v473_v63 = vshrl.u32 %v3416_v62, %v458_v45  ;;  %v459_v10 = vshrl.u32 %v3411_v47, %v458_v45  ;;  %vm477_vm5 = vcmp.lt.s32.totalorder %v456_v46, 3  ;;  %vm476_vm6 = vcmp.lt.s32.totalorder %v456_v46, 2  ;;  %v3604_v42 = vpop.eup %3240 }
  0xfd   : > { %v462_v1 = vor.u32 %v461_v52, %v460_v48  ;;  %v465_v2 = vor.u32 %v464_v54, %v463_v50  ;;  %v468_v3 = vor.u32 %v467_v57, %v466_v55  ;;  %v471_v4 = vor.u32 %v470_v60, %v469_v58 }
  0xfe   : > { %v474_v5 = vor.u32 %v473_v63, %v472_v61  ;;  %v2259_v46 = vrot.slane %v3604_v42, %v2258_v39  ;;  %v3614_v47 = vrot.slane %v3604_v42, %v2020_v40  ;;  %v3617_v50 = vpop.permute.xlu1 %581 }
  0xff   : > { %v480_v6 = vsel %vm478_vm4, %v468_v3, 2102212464  ;;  %v483_v7 = vsel %vm475_vm3, %v462_v1, %v465_v2  ;;  %v487_v8 = vsel %vm475_vm3, %v465_v2, %v468_v3  ;;  %v484_v11 = vsel %vm478_vm4, %v471_v4, 920167782 }
 0x100   : > { %v488_v15 = vsel %vm478_vm4, %v474_v5, 1326507024  ;;  %v485_v17 = vsel %vm477_vm5, %v468_v3, %v484_v11  ;;  %v479_v20 = vsel %vm475_vm3, %v459_v10, %v462_v1  ;;  %v481_v21 = vsel %vm477_vm5, %v465_v2, %v480_v6  ;;  %v3634_v10 = vld [vmem:[#allocation6] sm:$0xff]  }
 0x101   : > { %v489_v18 = vsel %vm477_vm5, %v471_v4, %v488_v15  ;;  %v486_v22 = vsel %vm476_vm6, %v483_v7, %v485_v17  ;;  %v482_v28 = vsel %vm476_vm6, %v479_v20, %v481_v21  ;;  %v2261_v49 = vsub.f32 %v2259_v46, %v3606_v43  ;;  %3023 = vmatprep.subr.bf16.mxu0 %v3634_v10 }
 0x102   : > { %v490_v23 = vsel %vm476_vm6, %v487_v8, %v489_v18  ;;  %v3591_v26 = vmul.u32.u64.low %v491_v19, %v486_v22  ;;  %v3592_v27 = vmul.u32.u64.high %v491_v19, %v486_v22, %v3591_v26  ;;  %v498_v30 = vmul.u32 %v491_v19, %v482_v28  ;;  %3041 = vmatprep.subr.bf16.mxu1 %v3634_v10  ;;  %3024 = vmatpush3.bf16.msra.mxu0 %v3634_v10 }
 0x103   : > { %v3588_v24 = vmul.u32.u64.low %v491_v19, %v490_v23  ;;  %v3589_v25 = vmul.u32.u64.high %v491_v19, %v490_v23, %v3588_v24  ;;  %v2023_v52 = vsub.f32 %v3614_v47, %v3606_v43  ;;  %v2263_v53 = vmul.f32 %v2261_v49, %v2261_v49  ;;  %3042 = vmatpush3.bf16.msra.mxu1 %v3634_v10  ;;  %3059 = vmatprep.subr.bf16.mxu0 %v3634_v10 }
 0x104   : > { %v501_v29 = vadd.s32 1, %v3592_v27  ;;  %v831_v4 = vrot.slane %v3604_v42, %v3573_v16  ;;  %v1782_v5 = vsub.s32 5, %v3564_v12  ;;  %v559_v8 = vrot.slane %v3604_v42, %v3567_v13  ;;  %3077 = vmatprep.subr.bf16.mxu1 %v3634_v10 }
 0x105   : > { %vm500_vm7 = vc.u32 %v3589_v25, %v3591_v26  ;;  %v2025_v55 = vmul.f32 %v2023_v52, %v2023_v52  ;;  %v3622_v56 = vmul.f32 %v2263_v53, %v3617_v50  ;;  %v499_v59 = vadd.s32 %v3591_v26, %v3589_v25 }
 0x106   : > { %v502_v31 = vsel %vm500_vm7, %v501_v29, %v3592_v27  ;;  %v832_v15 = vsub.f32 %v831_v4, %v3597_v33  ;;  %v1783_v17 = vrot.slane %v3604_v42, %v1782_v5  ;;  %v833_v18 = vsub.f32 %v831_v4, %v3606_v43  ;;  %v3662_v27 = vpop.permute.xlu0 %576 }
 0x107   : > { %v503_v32 = vadd.s32 %v502_v31, %v498_v30  ;;  %v3625_v57 = vmul.f32 %v2025_v55, %v3617_v50  ;;  %v570_v20 = vsub.f32 %v559_v8, %v3597_v33  ;;  %v1545_v21 = vrot.slane %v3604_v42, %v1544_v9 }
 0x108   : > { %v571_v22 = vsub.f32 %v559_v8, %v3606_v43  ;;  %v834_v25 = vmul.f32 %v832_v15, %v832_v15  ;;  %v1784_v26 = vsub.f32 %v1783_v17, %v3597_v33  ;;  %v835_v29 = vmul.f32 %v833_v18, %v833_v18 }
 0x109   : > { %v504_v34 = vadd.s32 536870912, %v503_v32  ;;  %v1785_v30 = vsub.f32 %v1783_v17, %v3606_v43  ;;  %v572_v41 = vmul.f32 %v570_v20, %v570_v20  ;;  %v1546_v31 = vsub.f32 %v1545_v21, %v3597_v33 }
 0x10a   : > { %v837_v49 = vmul.f32 %v835_v29, %v3617_v50  ;;  %v2030_v29 = vmul.f32 1.442695, %v3625_v57 }
 0x10b   : > { %v3599_v37 = vshrl.u32 %v504_v34, 30  ;;  %v573_v34 = vmul.f32 %v571_v22, %v571_v22  ;;  %v584_v52 = vmul.f32 %v3662_v27, %v572_v41  ;;  %v1548_v53 = vmul.f32 %v1546_v31, %v1546_v31  ;;  %v2620_v41 = vld [vmem:[#allocation4] ss:$0 sm:$0xff]  ;;  %v431_v31 = vpop.permute.xlu1 %430 }
 0x10c   : > { %vm439_vm0 = vcmp.eq.f32.partialorder %v431_v31, %v2620_v41 }
 0x10d   : > { %v506_v38 = vshll.u32 %v3599_v37, 30 }
 0x10f   : > { %v507_v44 = vsub.s32 %v503_v32, %v506_v38  ;;  %v529_v32 = vsub.s32 4, %v3599_v37  ;;  %v1547_v38 = vsub.f32 %v1545_v21, %v3606_v43  ;;  %v1306_v21 = vsub.s32 3, %v3564_v12 }
 0x111   : > { %v509_v45 = vsub.s32 0, %v507_v44  ;;  %v530_v55 = vsel %vm445_vm9, %v529_v32, %v3599_v37 }
 0x113   : > { %v2623_v48 = vmin.u32 %v509_v45, %v507_v44  ;;  %v1786_v45 = vmul.f32 %v1784_v26, %v1784_v26 }
 0x115   : > { %v511_v51 = vclz %v2623_v48  ;;  %v2260_v48 = vsub.f32 %v2259_v46, %v3597_v33 }
 0x117   : > { %v2624_v54 = vadd.s32 4294967294, %v511_v51  ;;  %v1787_v51 = vmul.f32 %v1785_v30, %v1785_v30  ;;  %v2262_v46 = vmul.f32 %v2260_v48, %v2260_v48 }
 0x119   : > { %vm2625_vm8 = vcmp.lt.s32.totalorder %v2624_v54, 0 }
 0x11a   : > { %v514_v58 = vsel %vm2625_vm8, 0, %v2624_v54  ;;  %v2022_v54 = vsub.f32 %v3614_v47, %v3597_v33  ;;  %v1550_v47 = vmul.f32 %v1548_v53, %v3662_v27 }
 0x11b   : > { %v515_v60 = vsub.s32 32, %v514_v58  ;;  %v519_v61 = vsub.s32 4294967266, %v514_v58  ;;  %v516_v62 = vshll.u32 %v507_v44, %v514_v58  ;;  %v836_v44 = vmul.f32 %v834_v25, %v3662_v27 }
 0x11c   : > { %v585_v58 = vmul.f32 %v3617_v50, %v573_v34 }
 0x11d   : > { %v517_v63 = vshrl.u32 %v499_v59, %v515_v60  ;;  %v520_v0 = vadd.s32 127, %v519_v61  ;;  %v1549_v59 = vmul.f32 %v1547_v38, %v1547_v38  ;;  %v838_v60 = vmul.f32 1.442695, %v836_v44 }
 0x11e   : > { %v1788_v61 = vmul.f32 %v1786_v45, %v3662_v27  ;;  %v1069_v38 = vrot.slane %v3604_v42, %v3570_v14  ;;  %v3417_v44 = vmov 0.0  }
 0x11f   : > { %v518_v1 = vor.u32 %v517_v63, %v516_v62  ;;  %v521_v2 = vshll.u32 %v520_v0, 23  ;;  %v840_v62 = vmul.f32 1.442695, %v837_v49  ;;  %v1789_v63 = vmul.f32 %v1787_v51, %v3617_v50 }
 0x120   : > { %v532_v0 = vsel %vm3655_vm10, 0, %v530_v55  ;;  %v1551_v37 = vmul.f32 %v1549_v59, %v3617_v50  ;;  %v1790_v4 = vmul.f32 1.442695, %v1788_v61  ;;  %v2626_v45 = vsel %vm548_vm15, 1.0, %v3417_v44 }
 0x121   : > { %v522_v3 = vor.u32 4788187, %v521_v2  ;;  %v525_v7 = vcvt.s32.f32 %v518_v1  ;;  %v586_v1 = vmul.f32 1.442695, %v584_v52  ;;  %v2024_v2 = vmul.f32 %v2022_v54, %v2022_v54 }
 0x122   : > { %v1792_v8 = vmul.f32 1.442695, %v1789_v63  ;;  %v1554_v18 = vmul.f32 1.442695, %v1551_v37  ;;  %v2621_v54 = vsel %vm439_vm0, 1.0, %v3417_v44  ;;  %v1070_v35 = vsub.f32 %v1069_v38, %v3597_v33 }
 0x123   : > { %v523_v6 = vand.u32 2147483647, %v522_v3  ;;  %v588_v3 = vmul.f32 1.442695, %v585_v58  ;;  %v2026_v15 = vmul.f32 %v2024_v2, %v3662_v27 }
 0x125   : > { %v526_v11 = vmul.f32 %v525_v7, %v523_v6  ;;  %v2264_v6 = vmul.f32 %v2262_v46, %v3662_v27  ;;  %v536_v7 = vand.u32 3, %v532_v0  ;;  %v2028_v26 = vmul.f32 1.442695, %v2026_v15 }
 0x127   : > { %v527_v19 = vxor.u32 2147483648, %v526_v11  ;;  %v2266_v22 = vmul.f32 1.442695, %v2264_v6  ;;  %vm541_vm11 = vcmp.eq.s32.totalorder %v536_v7, 2  ;;  %vm538_vm12 = vcmp.eq.s32.totalorder %v536_v7, 0 }
 0x128   : > { %vm537_vm13 = vcmp.lt.s32.totalorder %v536_v7, 2 }
 0x129   : > { %v528_v24 = vsel %vm445_vm9, %v527_v19, %v526_v11  ;;  %v1552_v11 = vmul.f32 1.442695, %v1550_v47 }
 0x12a   : > { %v531_v28 = vsel %vm3655_vm10, %v3581_v36, %v528_v24  ;;  %v2268_v24 = vmul.f32 1.442695, %v3622_v56  ;;  %v1307_v56 = vrot.slane %v3604_v42, %v1306_v21 }
 0x12b   : > { %3242 = vcosq.f32 %v531_v28 }
 0x12c   : > { %3244 = vsinq.f32 %v531_v28  ;;  %v1308_v48 = vsub.f32 %v1307_v56, %v3597_v33  ;;  %v1309_v52 = vsub.f32 %v1307_v56, %v3606_v43 }
 0x12d   : > { %3246 = vpow2.f32 %v838_v60  ;;  %v1071_v60 = vsub.f32 %v1069_v38, %v3606_v43 }
 0x12e   : > { %3248 = vpow2.f32 %v840_v62  ;;  %v1310_v42 = vmul.f32 %v1308_v48, %v1308_v48  ;;  %v1311_v63 = vmul.f32 %v1309_v52, %v1309_v52 }
 0x12f   : > { %3250 = vpow2.f32 %v586_v1  ;;  %v1072_v1 = vmul.f32 %v1070_v35, %v1070_v35  ;;  %v1073_v7 = vmul.f32 %v1071_v60, %v1071_v60 }
 0x130   : > { %3252 = vpow2.f32 %v588_v3 }
 0x131   : > { %3254 = vpow2.f32 %v1790_v4 }
 0x132   : > { %3256 = vpow2.f32 %v1792_v8 }
 0x133   : > { %3258 = vpow2.f32 %v1552_v11 }
 0x134   : > { %3260 = vpow2.f32 %v1554_v18 }
 0x135   : > { %3262 = vpow2.f32 %v2266_v22 }
 0x136   : > { %3264 = vpow2.f32 %v2268_v24 }
 0x137   : > { %3266 = vpow2.f32 %v2028_v26 }
 0x138   : > { %v3243_v17 = vpop.eup %3242  ;;  %3268 = vpow2.f32 %v2030_v29 }
 0x139   : > { %v3245_v19 = vpop.eup %3244  ;;  %v542_v20 = vxor.u32 2147483648, %v3243_v17 }
 0x13a   : > { %v539_v23 = vxor.u32 2147483648, %v3245_v19  ;;  %v3247_v57 = vpop.eup %3246 }
 0x13b   : > { %v543_v25 = vsel %vm541_vm11, %v542_v20, %v3245_v19  ;;  %v3249_v49 = vpop.eup %3248  ;;  %v1074_v19 = vmul.f32 %v1072_v1, %v3662_v27 }
 0x13c   : > { %v540_v28 = vsel %vm538_vm12, %v3243_v17, %v539_v23  ;;  %v3251_v53 = vpop.eup %3250 }
 0x13d   : > { %v544_v30 = vsel %vm537_vm13, %v540_v28, %v543_v25  ;;  %v3253_v55 = vpop.eup %3252 }
 0x13e   : > { %v545_v32 = vsel %vm535_vm14, nan, %v544_v30  ;;  %v3255_v59 = vpop.eup %3254 }
 0x13f   : > { %v546_v34 = vadd.f32 1.0, %v545_v32  ;;  %v3257_v61 = vpop.eup %3256 }
 0x140   : > { %v3259_v0 = vpop.eup %3258 }
 0x141   : > { %v547_v36 = vmul.f32 0.5, %v546_v34  ;;  %v3261_v3 = vpop.eup %3260  ;;  %v1076_v34 = vmul.f32 1.442695, %v1074_v19 }
 0x143   : > { %v551_v51 = vmul.f32 %v2626_v45, %v547_v36 }
 0x145   : > { %v552_v58 = vmul.f32 %v2621_v54, %v551_v51 }
 0x147   : > { %v845_v46 = vrot.slane %v552_v58, %v3573_v16  ;;  %v593_v62 = vrot.slane %v552_v58, %v3567_v13  ;;  %v1797_v47 = vrot.slane %v552_v58, %v1782_v5  ;;  %v1559_v33 = vrot.slane %v552_v58, %v1544_v9  ;;  %v3263_v16 = vpop.eup %3262 }
 0x148   : > { %v2273_v2 = vrot.slane %v552_v58, %v2258_v39  ;;  %v1312_v13 = vmul.f32 %v1310_v42, %v3662_v27  ;;  %v2035_v8 = vrot.slane %v552_v58, %v2020_v40  ;;  %v3265_v11 = vpop.eup %3264  ;;  %v1313_v39 = vmul.f32 %v1311_v63, %v3617_v50 }
 0x149   : > { %v846_v37 = vmul.f32 %v3247_v57, %v845_v46  ;;  %v847_v43 = vmul.f32 %v3249_v49, %v845_v46  ;;  %v594_v4 = vmul.f32 %v3251_v53, %v593_v62  ;;  %v595_v6 = vmul.f32 %v3253_v55, %v593_v62  ;;  %v3267_v18 = vpop.eup %3266 }
 0x14a   : > { %v1798_v17 = vmul.f32 %v3255_v59, %v1797_v47  ;;  %v1799_v9 = vmul.f32 %v3257_v61, %v1797_v47  ;;  %v1560_v20 = vmul.f32 %v3259_v0, %v1559_v33  ;;  %v1561_v22 = vmul.f32 %v3261_v3, %v1559_v33  ;;  %v3269_v23 = vpop.eup %3268 }
 0x14b   : > { %v848_v5 = vpack.c.bf16 %v847_v43, %v846_v37  ;;  %v596_v15 = vpack.c.bf16 %v595_v6, %v594_v4  ;;  %v2274_v25 = vmul.f32 %v3263_v16, %v2273_v2  ;;  %v2275_v26 = vmul.f32 %v3265_v11, %v2273_v2 }
 0x14c   : > { %v1800_v24 = vpack.c.bf16 %v1799_v9, %v1798_v17  ;;  %v1075_v40 = vmul.f32 %v1073_v7, %v3617_v50  ;;  %v1562_v28 = vpack.c.bf16 %v1561_v22, %v1560_v20  ;;  %v2036_v29 = vmul.f32 %v3267_v18, %v2035_v8 }
 0x14d   : > { %849 = vxpose.xlu1.c.b16.start.end [1/1] (short) %v848_v5, 128  ;;  %603 = vxpose.xlu0.c.b16.start.end [1/1] (short) %v596_v15, 128  ;;  %v2037_v30 = vmul.f32 %v3269_v23, %v2035_v8  ;;  %v1314_v41 = vmul.f32 1.442695, %v1312_v13  ;;  %v2276_v31 = vpack.c.bf16 %v2275_v26, %v2274_v25  ;;  %v1316_v32 = vmul.f32 1.442695, %v1313_v39 }
 0x14e   : > { %v1078_v38 = vmul.f32 1.442695, %v1075_v40  ;;  %v1321_v36 = vrot.slane %v552_v58, %v1306_v21  ;;  %v1083_v57 = vrot.slane %v552_v58, %v3570_v14 }
 0x14f   : > { %v2038_v56 = vpack.c.bf16 %v2037_v30, %v2036_v29  ;;  %3270 = vpow2.f32 %v1314_v41 }
 0x150   : > { %3272 = vpow2.f32 %v1316_v32 }
 0x151   : > { %3274 = vpow2.f32 %v1076_v34 }
 0x152   : > { %3276 = vpow2.f32 %v1078_v38 }
 0x15c   : > { %v3271_v27 = vpop.eup %3270 }
 0x15d   : > { %v3273_v50 = vpop.eup %3272  ;;  %v1322_v48 = vmul.f32 %v3271_v27, %v1321_v36 }
 0x15e   : > { %v3275_v44 = vpop.eup %3274  ;;  %v1323_v49 = vmul.f32 %v3273_v50, %v1321_v36 }
 0x15f   : > { %v3277_v45 = vpop.eup %3276  ;;  %v1084_v51 = vmul.f32 %v3275_v44, %v1083_v57 }
 0x160   : > { %v1085_v52 = vmul.f32 %v3277_v45, %v1083_v57  ;;  %v1324_v53 = vpack.c.bf16 %v1323_v49, %v1322_v48 }
 0x162   : > { %v1086_v54 = vpack.c.bf16 %v1085_v52, %v1084_v51 }
 0x16a   : > { %1325 = vxpose.xlu1.c.b16.start.end [1/1] (short) %v1324_v53, 128  ;;  %1087 = vxpose.xlu0.c.b16.start.end [1/1] (short) %v1086_v54, 128 }
 0x187   : > { %1801 = vxpose.xlu1.c.b16.start.end [1/1] (short) %v1800_v24, 128  ;;  %1563 = vxpose.xlu0.c.b16.start.end [1/1] (short) %v1562_v28, 128 }
 0x1a4   : > { %2277 = vxpose.xlu1.c.b16.start.end [1/1] (short) %v2276_v31, 128  ;;  %2039 = vxpose.xlu0.c.b16.start.end [1/1] (short) %v2038_v56, 128 }
 0x1af   : > { %v857_v12 = vpop.trf.xlu1  ;;  %v611_v21 = vpop.trf.xlu0 }
 0x1b0   : > { %3025 = vmatprep.mubr.msk.bf16.mxu0 %vm625_vm1, %v611_v21  ;;  %3043 = vmatprep.mubr.msk.bf16.mxu1 %vm625_vm1, %v857_v12  ;;  %v3795_v12 = vld [vmem:[#allocation7] ss:$0 sm:$0xff] }
 0x1b3   : > { %v858_v14 = vpop.trf.xlu1  ;;  %v612_v35 = vpop.trf.xlu0 }
 0x1b4   : > { %3026 = vmatmul.mubr.msk.bf16.vlgmr.msra.gmra.mxu0 %vm625_vm1, %v612_v35  ;;  %3044 = vmatmul.mubr.msk.bf16.vlgmr.msra.gmra.mxu1 %vm625_vm1, %v858_v14 }
 0x1b5   : > { %3060 = vmatpush3.bf16.msra.mxu0 %v3634_v10  ;;  %3078 = vmatpush3.bf16.msra.mxu1 %v3634_v10 }
 0x1b6   : > { %3113 = vmatprep.subr.bf16.mxu1 %v3634_v10  ;;  %3095 = vmatprep.subr.bf16.mxu0 %v3634_v10 }
 0x1b7   : > { %v859_v55 = vpop.trf.xlu1  ;;  %v613_v58 = vpop.trf.xlu0 }
 0x1b8   : > { %3029 = vmatprep.mubr.msk.bf16.mxu0 %vm625_vm1, %v613_v58  ;;  %3047 = vmatprep.mubr.msk.bf16.mxu1 %vm625_vm1, %v859_v55 }
 0x1bb   : > { %v860_v59 = vpop.trf.xlu1  ;;  %v614_v42 = vpop.trf.xlu0 }
 0x1bc   : > { %3030 = vmatmul.mubr.msk.bf16.gmra.mxu0 %vm625_vm1, %v614_v42  ;;  %3048 = vmatmul.mubr.msk.bf16.gmra.mxu1 %vm625_vm1, %v860_v59 }
 0x1bf   : > { %v861_v60 = vpop.trf.xlu1  ;;  %v615_v61 = vpop.trf.xlu0 }
 0x1c0   : > { %3033 = vmatprep.mubr.msk.bf16.mxu0 %vm625_vm1, %v615_v61  ;;  %3051 = vmatprep.mubr.msk.bf16.mxu1 %vm625_vm1, %v861_v60 }
 0x1c3   : > { %v862_v46 = vpop.trf.xlu1  ;;  %v616_v62 = vpop.trf.xlu0 }
 0x1c4   : > { %3034 = vmatmul.mubr.msk.bf16.gmra.mxu0 %vm625_vm1, %v616_v62  ;;  %3052 = vmatmul.mubr.msk.bf16.gmra.mxu1 %vm625_vm1, %v862_v46 }
 0x1c7   : > { %v863_v63 = vpop.trf.xlu1  ;;  %v617_v0 = vpop.trf.xlu0 }
 0x1c8   : > { %3037 = vmatprep.mubr.msk.bf16.mxu0 %vm625_vm1, %v617_v0  ;;  %3055 = vmatprep.mubr.msk.bf16.mxu1 %vm625_vm1, %v863_v63 }
 0x1cb   : > { %v864_v1 = vpop.trf.xlu1  ;;  %v618_v47 = vpop.trf.xlu0 }
 0x1cc   : > { %3038 = vmatmul.mubr.msk.bf16.gmra.mxu0 %vm625_vm1, %v618_v47  ;;  %3056 = vmatmul.mubr.msk.bf16.gmra.mxu1 %vm625_vm1, %v864_v1 }
 0x1cf   : > { %v1333_v33 = vpop.trf.xlu1  ;;  %v1095_v2 = vpop.trf.xlu0 }
 0x1d0   : > { %3061 = vmatprep.mubr.msk.bf16.mxu0 %vm625_vm1, %v1095_v2  ;;  %3079 = vmatprep.mubr.msk.bf16.mxu1 %vm625_vm1, %v1333_v33 }
 0x1d3   : > { %v1334_v3 = vpop.trf.xlu1  ;;  %v1096_v37 = vpop.trf.xlu0 }
 0x1d4   : > { %3062 = vmatmul.mubr.msk.bf16.vlgmr.msra.gmra.mxu0 %vm625_vm1, %v1096_v37  ;;  %3080 = vmatmul.mubr.msk.bf16.vlgmr.msra.gmra.mxu1 %vm625_vm1, %v1334_v3 }
 0x1d5   : > { %3096 = vmatpush3.bf16.msra.mxu0 %v3634_v10  ;;  %3114 = vmatpush3.bf16.msra.mxu1 %v3634_v10 }
 0x1d6   : > { %3149 = vmatprep.subr.bf16.mxu1 %v3634_v10  ;;  %3131 = vmatprep.subr.bf16.mxu0 %v3634_v10 }
 0x1d7   : > { %v1335_v43 = vpop.trf.xlu1  ;;  %v1097_v4 = vpop.trf.xlu0 }
 0x1d8   : > { %3065 = vmatprep.mubr.msk.bf16.mxu0 %vm625_vm1, %v1097_v4  ;;  %3083 = vmatprep.mubr.msk.bf16.mxu1 %vm625_vm1, %v1335_v43 }
 0x1db   : > { %v1336_v6 = vpop.trf.xlu1  ;;  %v1098_v16 = vpop.trf.xlu0 }
 0x1dc   : > { %3066 = vmatmul.mubr.msk.bf16.gmra.mxu0 %vm625_vm1, %v1098_v16  ;;  %3084 = vmatmul.mubr.msk.bf16.gmra.mxu1 %vm625_vm1, %v1336_v6 }
 0x1df   : > { %v1337_v13 = vpop.trf.xlu1  ;;  %v1099_v7 = vpop.trf.xlu0 }
 0x1e0   : > { %3069 = vmatprep.mubr.msk.bf16.mxu0 %vm625_vm1, %v1099_v7  ;;  %3087 = vmatprep.mubr.msk.bf16.mxu1 %vm625_vm1, %v1337_v13 }
 0x1e3   : > { %v1338_v8 = vpop.trf.xlu1  ;;  %v1100_v11 = vpop.trf.xlu0 }
 0x1e4   : > { %3070 = vmatmul.mubr.msk.bf16.gmra.mxu0 %vm625_vm1, %v1100_v11  ;;  %3088 = vmatmul.mubr.msk.bf16.gmra.mxu1 %vm625_vm1, %v1338_v8 }
 0x1e7   : > { %v1339_v5 = vpop.trf.xlu1  ;;  %v1101_v15 = vpop.trf.xlu0 }
 0x1e8   : > { %3073 = vmatprep.mubr.msk.bf16.mxu0 %vm625_vm1, %v1101_v15  ;;  %3091 = vmatprep.mubr.msk.bf16.mxu1 %vm625_vm1, %v1339_v5 }
 0x1eb   : > { %v1340_v17 = vpop.trf.xlu1  ;;  %v1102_v9 = vpop.trf.xlu0 }
 0x1ec   : > { %3074 = vmatmul.mubr.msk.bf16.gmra.mxu0 %vm625_vm1, %v1102_v9  ;;  %3092 = vmatmul.mubr.msk.bf16.gmra.mxu1 %vm625_vm1, %v1340_v17 }
 0x1ef   : > { %v1809_v18 = vpop.trf.xlu1  ;;  %v1571_v39 = vpop.trf.xlu0 }
 0x1f0   : > { %3097 = vmatprep.mubr.msk.bf16.mxu0 %vm625_vm1, %v1571_v39  ;;  %3115 = vmatprep.mubr.msk.bf16.mxu1 %vm625_vm1, %v1809_v18 }
 0x1f3   : > { %v1810_v19 = vpop.trf.xlu1  ;;  %v1572_v20 = vpop.trf.xlu0 }
 0x1f4   : > { %3098 = vmatmul.mubr.msk.bf16.vlgmr.msra.gmra.mxu0 %vm625_vm1, %v1572_v20  ;;  %3116 = vmatmul.mubr.msk.bf16.vlgmr.msra.gmra.mxu1 %vm625_vm1, %v1810_v19 }
 0x1f5   : > { %3132 = vmatpush3.bf16.msra.mxu0 %v3634_v10  ;;  %3150 = vmatpush3.bf16.msra.mxu1 %v3634_v10 }
 0x1f7   : > { %v1811_v22 = vpop.trf.xlu1  ;;  %v1573_v23 = vpop.trf.xlu0 }
 0x1f8   : > { %3101 = vmatprep.mubr.msk.bf16.mxu0 %vm625_vm1, %v1573_v23  ;;  %3119 = vmatprep.mubr.msk.bf16.mxu1 %vm625_vm1, %v1811_v22 }
 0x1fb   : > { %v1812_v24 = vpop.trf.xlu1  ;;  %v1574_v25 = vpop.trf.xlu0 }
 0x1fc   : > { %3102 = vmatmul.mubr.msk.bf16.gmra.mxu0 %vm625_vm1, %v1574_v25  ;;  %3120 = vmatmul.mubr.msk.bf16.gmra.mxu1 %vm625_vm1, %v1812_v24 }
 0x1ff   : > { %v1813_v26 = vpop.trf.xlu1  ;;  %v1575_v40 = vpop.trf.xlu0 }
 0x200   : > { %3105 = vmatprep.mubr.msk.bf16.mxu0 %vm625_vm1, %v1575_v40  ;;  %3123 = vmatprep.mubr.msk.bf16.mxu1 %vm625_vm1, %v1813_v26 }
 0x203   : > { %v1814_v28 = vpop.trf.xlu1  ;;  %v1576_v10 = vpop.trf.xlu0 }
 0x204   : > { %3106 = vmatmul.mubr.msk.bf16.gmra.mxu0 %vm625_vm1, %v1576_v10  ;;  %3124 = vmatmul.mubr.msk.bf16.gmra.mxu1 %vm625_vm1, %v1814_v28 }
 0x207   : > { %v1815_v29 = vpop.trf.xlu1  ;;  %v1577_v30 = vpop.trf.xlu0 }
 0x208   : > { %3109 = vmatprep.mubr.msk.bf16.mxu0 %vm625_vm1, %v1577_v30  ;;  %3127 = vmatprep.mubr.msk.bf16.mxu1 %vm625_vm1, %v1815_v29 }
 0x20b   : > { %v1816_v41 = vpop.trf.xlu1  ;;  %v1578_v31 = vpop.trf.xlu0 }
 0x20c   : > { %3110 = vmatmul.mubr.msk.bf16.gmra.mxu0 %vm625_vm1, %v1578_v31  ;;  %3128 = vmatmul.mubr.msk.bf16.gmra.mxu1 %vm625_vm1, %v1816_v41 }
 0x20f   : > { %v2285_v32 = vpop.trf.xlu1  ;;  %v2047_v56 = vpop.trf.xlu0 }
 0x210   : > { %3133 = vmatprep.mubr.msk.bf16.mxu0 %vm625_vm1, %v2047_v56  ;;  %3151 = vmatprep.mubr.msk.bf16.mxu1 %vm625_vm1, %v2285_v32 }
 0x213   : > { %v2286_v34 = vpop.trf.xlu1  ;;  %v2048_v38 = vpop.trf.xlu0 }
 0x214   : > { %3134 = vmatmul.mubr.msk.bf16.vlgmr.msra.gmra.mxu0 %vm625_vm1, %v2048_v38  ;;  %3152 = vmatmul.mubr.msk.bf16.vlgmr.msra.gmra.mxu1 %vm625_vm1, %v2286_v34 }
 0x217   : > { %v2287_v27 = vpop.trf.xlu1  ;;  %v2049_v36 = vpop.trf.xlu0 }
 0x218   : > { %3137 = vmatprep.mubr.msk.bf16.mxu0 %vm625_vm1, %v2049_v36  ;;  %3155 = vmatprep.mubr.msk.bf16.mxu1 %vm625_vm1, %v2287_v27 }
 0x21b   : > { %v2288_v57 = vpop.trf.xlu1  ;;  %v2050_v50 = vpop.trf.xlu0 }
 0x21c   : > { %3138 = vmatmul.mubr.msk.bf16.gmra.mxu0 %vm625_vm1, %v2050_v50  ;;  %3156 = vmatmul.mubr.msk.bf16.gmra.mxu1 %vm625_vm1, %v2288_v57 }
 0x21f   : > { %v2289_v44 = vpop.trf.xlu1  ;;  %v2051_v45 = vpop.trf.xlu0 }
 0x220   : > { %3141 = vmatprep.mubr.msk.bf16.mxu0 %vm625_vm1, %v2051_v45  ;;  %3159 = vmatprep.mubr.msk.bf16.mxu1 %vm625_vm1, %v2289_v44 }
 0x223   : > { %v2290_v48 = vpop.trf.xlu1  ;;  %v2052_v49 = vpop.trf.xlu0 }
 0x224   : > { %3142 = vmatmul.mubr.msk.bf16.gmra.mxu0 %vm625_vm1, %v2052_v49  ;;  %3160 = vmatmul.mubr.msk.bf16.gmra.mxu1 %vm625_vm1, %v2290_v48 }
 0x227   : > { %v2291_v51 = vpop.trf.xlu1  ;;  %v2053_v52 = vpop.trf.xlu0 }
 0x228   : > { %3145 = vmatprep.mubr.msk.bf16.mxu0 %vm625_vm1, %v2053_v52  ;;  %3163 = vmatprep.mubr.msk.bf16.mxu1 %vm625_vm1, %v2291_v51 }
 0x22b   : > { %v2292_v53 = vpop.trf.xlu1  ;;  %v2054_v54 = vpop.trf.xlu0 }
 0x22c   : > { %3146 = vmatmul.mubr.msk.bf16.gmra.mxu0 %vm625_vm1, %v2054_v54  ;;  %3164 = vmatmul.mubr.msk.bf16.gmra.mxu1 %vm625_vm1, %v2292_v53 }
 0x274   : > { %v3027_v21 = vpop.f32.mrf.mxu0  ;;  %v3045_v14 = vpop.f32.mrf.mxu1 }
 0x275   : > { %v693_v35 = vadd.f32 %v3027_v21, %v3795_v12  ;;  %v932_v55 = vadd.f32 %v3045_v14, %v3795_v12 }
 0x276   : > { %v684_v58 = vpop.f32.mrf.mxu0  ;;  %v923_v59 = vpop.f32.mrf.mxu1 }
 0x277   : > { %v2825_v42 = vpack.c.bf16 %v693_v35, %v693_v35  ;;  %v2841_v60 = vpack.c.bf16 %v932_v55, %v932_v55  ;;  %v685_v61 = vadd.f32 %v3795_v12, %v684_v58  ;;  %v924_v46 = vadd.f32 %v3795_v12, %v923_v59 }
 0x278   : > { %v3028_v62 = vpop.f32.mrf.mxu0  ;;  %v3046_v63 = vpop.f32.mrf.mxu1 }
 0x279   : > { %814 = vst.msk [vmem:[%s3802_s9 + $0x8] sm:$0xf] %vm811_vm2, %v2825_v42  ;;  %1052 = vst.msk [vmem:[%s3802_s9 + $0x48] sm:$0xf] %vm811_vm2, %v2841_v60  ;;  %v2823_v0 = vpack.c.bf16 %v685_v61, %v685_v61  ;;  %v2839_v1 = vpack.c.bf16 %v924_v46, %v924_v46  ;;  %v696_v47 = vadd.f32 %v3028_v62, %v3795_v12 }
 0x27a   : > { %v935_v33 = vadd.f32 %v3046_v63, %v3795_v12  ;;  %v687_v2 = vpop.f32.mrf.mxu0  ;;  %v926_v3 = vpop.f32.mrf.mxu1 }
 0x27b   : > { %812 = vst.msk [vmem:[%s3802_s9] sm:$0xf] %vm811_vm2, %v2823_v0  ;;  %1050 = vst.msk [vmem:[%s3802_s9 + $0x40] sm:$0xf] %vm811_vm2, %v2839_v1  ;;  %v2826_v37 = vpack.c.bf16 %v696_v47, %v696_v47  ;;  %v688_v4 = vadd.f32 %v3795_v12, %v687_v2  ;;  %v927_v6 = vadd.f32 %v3795_v12, %v926_v3 }
 0x27c   : > { %v2842_v43 = vpack.c.bf16 %v935_v33, %v935_v33  ;;  %v3031_v16 = vpop.f32.mrf.mxu0  ;;  %v3049_v13 = vpop.f32.mrf.mxu1 }
 0x27d   : > { %815 = vst.msk [vmem:[%s3802_s9 + $0xc] sm:$0xf] %vm811_vm2, %v2826_v37  ;;  %v2824_v7 = vpack.c.bf16 %v688_v4, %v688_v4  ;;  %v2840_v8 = vpack.c.bf16 %v927_v6, %v927_v6  ;;  %v709_v11 = vadd.f32 %v3031_v16, %v3795_v12  ;;  %v948_v5 = vadd.f32 %v3049_v13, %v3795_v12 }
 0x27e   : > { %1053 = vst.msk [vmem:[%s3802_s9 + $0x4c] sm:$0xf] %vm811_vm2, %v2842_v43  ;;  %v700_v15 = vpop.f32.mrf.mxu0  ;;  %v939_v17 = vpop.f32.mrf.mxu1 }
 0x27f   : > { %813 = vst.msk [vmem:[%s3802_s9 + $0x4] sm:$0xf] %vm811_vm2, %v2824_v7  ;;  %1051 = vst.msk [vmem:[%s3802_s9 + $0x44] sm:$0xf] %vm811_vm2, %v2840_v8  ;;  %v2829_v9 = vpack.c.bf16 %v709_v11, %v709_v11  ;;  %v2845_v18 = vpack.c.bf16 %v948_v5, %v948_v5  ;;  %v701_v39 = vadd.f32 %v3795_v12, %v700_v15 }
 0x280   : > { %v940_v19 = vadd.f32 %v3795_v12, %v939_v17  ;;  %v3032_v20 = vpop.f32.mrf.mxu0  ;;  %v3050_v22 = vpop.f32.mrf.mxu1 }
 0x281   : > { %818 = vst.msk [vmem:[%s3802_s9 + $0x18] sm:$0xf] %vm811_vm2, %v2829_v9  ;;  %1056 = vst.msk [vmem:[%s3802_s9 + $0x58] sm:$0xf] %vm811_vm2, %v2845_v18  ;;  %v2827_v23 = vpack.c.bf16 %v701_v39, %v701_v39  ;;  %v712_v25 = vadd.f32 %v3032_v20, %v3795_v12  ;;  %v951_v26 = vadd.f32 %v3050_v22, %v3795_v12 }
 0x282   : > { %v2843_v24 = vpack.c.bf16 %v940_v19, %v940_v19  ;;  %v703_v40 = vpop.f32.mrf.mxu0  ;;  %v942_v28 = vpop.f32.mrf.mxu1 }
 0x283   : > { %816 = vst.msk [vmem:[%s3802_s9 + $0x10] sm:$0xf] %vm811_vm2, %v2827_v23  ;;  %v2830_v10 = vpack.c.bf16 %v712_v25, %v712_v25  ;;  %v2846_v29 = vpack.c.bf16 %v951_v26, %v951_v26  ;;  %v704_v30 = vadd.f32 %v3795_v12, %v703_v40  ;;  %v943_v41 = vadd.f32 %v3795_v12, %v942_v28 }
 0x284   : > { %1054 = vst.msk [vmem:[%s3802_s9 + $0x50] sm:$0xf] %vm811_vm2, %v2843_v24  ;;  %v3035_v31 = vpop.f32.mrf.mxu0  ;;  %v3053_v32 = vpop.f32.mrf.mxu1 }
 0x285   : > { %819 = vst.msk [vmem:[%s3802_s9 + $0x1c] sm:$0xf] %vm811_vm2, %v2830_v10  ;;  %1057 = vst.msk [vmem:[%s3802_s9 + $0x5c] sm:$0xf] %vm811_vm2, %v2846_v29  ;;  %v2828_v56 = vpack.c.bf16 %v704_v30, %v704_v30  ;;  %v2844_v34 = vpack.c.bf16 %v943_v41, %v943_v41  ;;  %v725_v38 = vadd.f32 %v3035_v31, %v3795_v12 }
 0x286   : > { %v964_v27 = vadd.f32 %v3053_v32, %v3795_v12  ;;  %v716_v36 = vpop.f32.mrf.mxu0  ;;  %v955_v57 = vpop.f32.mrf.mxu1 }
 0x287   : > { %817 = vst.msk [vmem:[%s3802_s9 + $0x14] sm:$0xf] %vm811_vm2, %v2828_v56  ;;  %1055 = vst.msk [vmem:[%s3802_s9 + $0x54] sm:$0xf] %vm811_vm2, %v2844_v34  ;;  %v2833_v50 = vpack.c.bf16 %v725_v38, %v725_v38  ;;  %v717_v45 = vadd.f32 %v3795_v12, %v716_v36  ;;  %v956_v48 = vadd.f32 %v3795_v12, %v955_v57 }
 0x288   : > { %v2849_v44 = vpack.c.bf16 %v964_v27, %v964_v27  ;;  %v3036_v49 = vpop.f32.mrf.mxu0  ;;  %v3054_v51 = vpop.f32.mrf.mxu1 }
 0x289   : > { %822 = vst.msk [vmem:[%s3802_s9 + $0x28] sm:$0xf] %vm811_vm2, %v2833_v50  ;;  %v2831_v52 = vpack.c.bf16 %v717_v45, %v717_v45  ;;  %v2847_v53 = vpack.c.bf16 %v956_v48, %v956_v48  ;;  %v728_v54 = vadd.f32 %v3036_v49, %v3795_v12  ;;  %v967_v21 = vadd.f32 %v3054_v51, %v3795_v12 }
 0x28a   : > { %1060 = vst.msk [vmem:[%s3802_s9 + $0x68] sm:$0xf] %vm811_vm2, %v2849_v44  ;;  %v719_v14 = vpop.f32.mrf.mxu0  ;;  %v958_v35 = vpop.f32.mrf.mxu1 }
 0x28b   : > { %820 = vst.msk [vmem:[%s3802_s9 + $0x20] sm:$0xf] %vm811_vm2, %v2831_v52  ;;  %1058 = vst.msk [vmem:[%s3802_s9 + $0x60] sm:$0xf] %vm811_vm2, %v2847_v53  ;;  %v2834_v55 = vpack.c.bf16 %v728_v54, %v728_v54  ;;  %v2850_v58 = vpack.c.bf16 %v967_v21, %v967_v21  ;;  %v720_v59 = vadd.f32 %v3795_v12, %v719_v14 }
 0x28c   : > { %v959_v42 = vadd.f32 %v3795_v12, %v958_v35  ;;  %v3039_v60 = vpop.f32.mrf.mxu0  ;;  %v3057_v61 = vpop.f32.mrf.mxu1 }
 0x28d   : > { %823 = vst.msk [vmem:[%s3802_s9 + $0x2c] sm:$0xf] %vm811_vm2, %v2834_v55  ;;  %1061 = vst.msk [vmem:[%s3802_s9 + $0x6c] sm:$0xf] %vm811_vm2, %v2850_v58  ;;  %v2832_v46 = vpack.c.bf16 %v720_v59, %v720_v59  ;;  %v741_v63 = vadd.f32 %v3039_v60, %v3795_v12  ;;  %v980_v0 = vadd.f32 %v3057_v61, %v3795_v12 }
 0x28e   : > { %v2848_v62 = vpack.c.bf16 %v959_v42, %v959_v42  ;;  %v732_v1 = vpop.f32.mrf.mxu0  ;;  %v971_v47 = vpop.f32.mrf.mxu1 }
 0x28f   : > { %821 = vst.msk [vmem:[%s3802_s9 + $0x24] sm:$0xf] %vm811_vm2, %v2832_v46  ;;  %v2837_v33 = vpack.c.bf16 %v741_v63, %v741_v63  ;;  %v2853_v2 = vpack.c.bf16 %v980_v0, %v980_v0  ;;  %v733_v3 = vadd.f32 %v3795_v12, %v732_v1  ;;  %v972_v37 = vadd.f32 %v3795_v12, %v971_v47 }
 0x290   : > { %1059 = vst.msk [vmem:[%s3802_s9 + $0x64] sm:$0xf] %vm811_vm2, %v2848_v62  ;;  %v3040_v43 = vpop.f32.mrf.mxu0  ;;  %v3058_v4 = vpop.f32.mrf.mxu1 }
 0x291   : > { %826 = vst.msk [vmem:[%s3802_s9 + $0x38] sm:$0xf] %vm811_vm2, %v2837_v33  ;;  %1064 = vst.msk [vmem:[%s3802_s9 + $0x78] sm:$0xf] %vm811_vm2, %v2853_v2  ;;  %v2835_v6 = vpack.c.bf16 %v733_v3, %v733_v3  ;;  %v2851_v16 = vpack.c.bf16 %v972_v37, %v972_v37  ;;  %v744_v13 = vadd.f32 %v3040_v43, %v3795_v12 }
 0x292   : > { %v983_v7 = vadd.f32 %v3058_v4, %v3795_v12  ;;  %v735_v8 = vpop.f32.mrf.mxu0  ;;  %v974_v11 = vpop.f32.mrf.mxu1 }
 0x293   : > { %824 = vst.msk [vmem:[%s3802_s9 + $0x30] sm:$0xf] %vm811_vm2, %v2835_v6  ;;  %1062 = vst.msk [vmem:[%s3802_s9 + $0x70] sm:$0xf] %vm811_vm2, %v2851_v16  ;;  %v2838_v5 = vpack.c.bf16 %v744_v13, %v744_v13  ;;  %v736_v17 = vadd.f32 %v3795_v12, %v735_v8  ;;  %v975_v9 = vadd.f32 %v3795_v12, %v974_v11 }
 0x294   : > { %v2854_v15 = vpack.c.bf16 %v983_v7, %v983_v7  ;;  %v3063_v18 = vpop.f32.mrf.mxu0  ;;  %v3081_v39 = vpop.f32.mrf.mxu1 }
 0x295   : > { %827 = vst.msk [vmem:[%s3802_s9 + $0x3c] sm:$0xf] %vm811_vm2, %v2838_v5  ;;  %v2836_v19 = vpack.c.bf16 %v736_v17, %v736_v17  ;;  %v2852_v20 = vpack.c.bf16 %v975_v9, %v975_v9  ;;  %v1170_v22 = vadd.f32 %v3063_v18, %v3795_v12  ;;  %v1408_v23 = vadd.f32 %v3081_v39, %v3795_v12 }
 0x296   : > { %1065 = vst.msk [vmem:[%s3802_s9 + $0x7c] sm:$0xf] %vm811_vm2, %v2854_v15  ;;  %v1161_v24 = vpop.f32.mrf.mxu0  ;;  %v1399_v25 = vpop.f32.mrf.mxu1 }
 0x297   : > { %825 = vst.msk [vmem:[%s3802_s9 + $0x34] sm:$0xf] %vm811_vm2, %v2836_v19  ;;  %1063 = vst.msk [vmem:[%s3802_s9 + $0x74] sm:$0xf] %vm811_vm2, %v2852_v20  ;;  %v2857_v26 = vpack.c.bf16 %v1170_v22, %v1170_v22  ;;  %v2873_v40 = vpack.c.bf16 %v1408_v23, %v1408_v23  ;;  %v1162_v28 = vadd.f32 %v3795_v12, %v1161_v24 }
 0x298   : > { %v1400_v10 = vadd.f32 %v3795_v12, %v1399_v25  ;;  %v3064_v29 = vpop.f32.mrf.mxu0  ;;  %v3082_v30 = vpop.f32.mrf.mxu1 }
 0x299   : > { %1290 = vst.msk [vmem:[%s3802_s9 + $0x88] sm:$0xf] %vm811_vm2, %v2857_v26  ;;  %1528 = vst.msk [vmem:[%s3802_s9 + $0xc8] sm:$0xf] %vm811_vm2, %v2873_v40  ;;  %v2855_v41 = vpack.c.bf16 %v1162_v28, %v1162_v28  ;;  %v1173_v32 = vadd.f32 %v3064_v29, %v3795_v12  ;;  %v1411_v56 = vadd.f32 %v3082_v30, %v3795_v12 }
 0x29a   : > { %v2871_v31 = vpack.c.bf16 %v1400_v10, %v1400_v10  ;;  %v1164_v34 = vpop.f32.mrf.mxu0  ;;  %v1402_v38 = vpop.f32.mrf.mxu1 }
 0x29b   : > { %1288 = vst.msk [vmem:[%s3802_s9 + $0x80] sm:$0xf] %vm811_vm2, %v2855_v41  ;;  %v2858_v27 = vpack.c.bf16 %v1173_v32, %v1173_v32  ;;  %v2874_v36 = vpack.c.bf16 %v1411_v56, %v1411_v56  ;;  %v1165_v57 = vadd.f32 %v3795_v12, %v1164_v34  ;;  %v1403_v50 = vadd.f32 %v3795_v12, %v1402_v38 }
 0x29c   : > { %1526 = vst.msk [vmem:[%s3802_s9 + $0xc0] sm:$0xf] %vm811_vm2, %v2871_v31  ;;  %v3067_v44 = vpop.f32.mrf.mxu0  ;;  %v3085_v45 = vpop.f32.mrf.mxu1 }
 0x29d   : > { %1291 = vst.msk [vmem:[%s3802_s9 + $0x8c] sm:$0xf] %vm811_vm2, %v2858_v27  ;;  %1529 = vst.msk [vmem:[%s3802_s9 + $0xcc] sm:$0xf] %vm811_vm2, %v2874_v36  ;;  %v2856_v48 = vpack.c.bf16 %v1165_v57, %v1165_v57  ;;  %v2872_v49 = vpack.c.bf16 %v1403_v50, %v1403_v50  ;;  %v1186_v51 = vadd.f32 %v3067_v44, %v3795_v12 }
 0x29e   : > { %v1424_v52 = vadd.f32 %v3085_v45, %v3795_v12  ;;  %v1177_v53 = vpop.f32.mrf.mxu0  ;;  %v1415_v54 = vpop.f32.mrf.mxu1 }
 0x29f   : > { %1289 = vst.msk [vmem:[%s3802_s9 + $0x84] sm:$0xf] %vm811_vm2, %v2856_v48  ;;  %1527 = vst.msk [vmem:[%s3802_s9 + $0xc4] sm:$0xf] %vm811_vm2, %v2872_v49  ;;  %v2861_v21 = vpack.c.bf16 %v1186_v51, %v1186_v51  ;;  %v1178_v35 = vadd.f32 %v3795_v12, %v1177_v53  ;;  %v1416_v55 = vadd.f32 %v3795_v12, %v1415_v54 }
 0x2a0   : > { %v2877_v14 = vpack.c.bf16 %v1424_v52, %v1424_v52  ;;  %v3068_v58 = vpop.f32.mrf.mxu0  ;;  %v3086_v59 = vpop.f32.mrf.mxu1 }
 0x2a1   : > { %1294 = vst.msk [vmem:[%s3802_s9 + $0x98] sm:$0xf] %vm811_vm2, %v2861_v21  ;;  %v2859_v42 = vpack.c.bf16 %v1178_v35, %v1178_v35  ;;  %v2875_v60 = vpack.c.bf16 %v1416_v55, %v1416_v55  ;;  %v1189_v61 = vadd.f32 %v3068_v58, %v3795_v12  ;;  %v1427_v46 = vadd.f32 %v3086_v59, %v3795_v12 }
 0x2a2   : > { %1532 = vst.msk [vmem:[%s3802_s9 + $0xd8] sm:$0xf] %vm811_vm2, %v2877_v14  ;;  %v1180_v62 = vpop.f32.mrf.mxu0  ;;  %v1418_v63 = vpop.f32.mrf.mxu1 }
 0x2a3   : > { %1292 = vst.msk [vmem:[%s3802_s9 + $0x90] sm:$0xf] %vm811_vm2, %v2859_v42  ;;  %1530 = vst.msk [vmem:[%s3802_s9 + $0xd0] sm:$0xf] %vm811_vm2, %v2875_v60  ;;  %v2862_v0 = vpack.c.bf16 %v1189_v61, %v1189_v61  ;;  %v2878_v1 = vpack.c.bf16 %v1427_v46, %v1427_v46  ;;  %v1181_v47 = vadd.f32 %v3795_v12, %v1180_v62 }
 0x2a4   : > { %v1419_v33 = vadd.f32 %v3795_v12, %v1418_v63  ;;  %v3071_v2 = vpop.f32.mrf.mxu0  ;;  %v3089_v3 = vpop.f32.mrf.mxu1 }
 0x2a5   : > { %1295 = vst.msk [vmem:[%s3802_s9 + $0x9c] sm:$0xf] %vm811_vm2, %v2862_v0  ;;  %1533 = vst.msk [vmem:[%s3802_s9 + $0xdc] sm:$0xf] %vm811_vm2, %v2878_v1  ;;  %v2860_v37 = vpack.c.bf16 %v1181_v47, %v1181_v47  ;;  %v1202_v4 = vadd.f32 %v3071_v2, %v3795_v12  ;;  %v1440_v6 = vadd.f32 %v3089_v3, %v3795_v12 }
 0x2a6   : > { %v2876_v43 = vpack.c.bf16 %v1419_v33, %v1419_v33  ;;  %v1193_v16 = vpop.f32.mrf.mxu0  ;;  %v1431_v13 = vpop.f32.mrf.mxu1 }
 0x2a7   : > { %1293 = vst.msk [vmem:[%s3802_s9 + $0x94] sm:$0xf] %vm811_vm2, %v2860_v37  ;;  %v2865_v7 = vpack.c.bf16 %v1202_v4, %v1202_v4  ;;  %v2881_v8 = vpack.c.bf16 %v1440_v6, %v1440_v6  ;;  %v1194_v11 = vadd.f32 %v3795_v12, %v1193_v16  ;;  %v1432_v5 = vadd.f32 %v3795_v12, %v1431_v13 }
 0x2a8   : > { %1531 = vst.msk [vmem:[%s3802_s9 + $0xd4] sm:$0xf] %vm811_vm2, %v2876_v43  ;;  %v3072_v15 = vpop.f32.mrf.mxu0  ;;  %v3090_v17 = vpop.f32.mrf.mxu1 }
 0x2a9   : > { %1298 = vst.msk [vmem:[%s3802_s9 + $0xa8] sm:$0xf] %vm811_vm2, %v2865_v7  ;;  %1536 = vst.msk [vmem:[%s3802_s9 + $0xe8] sm:$0xf] %vm811_vm2, %v2881_v8  ;;  %v2863_v9 = vpack.c.bf16 %v1194_v11, %v1194_v11  ;;  %v2879_v18 = vpack.c.bf16 %v1432_v5, %v1432_v5  ;;  %v1205_v39 = vadd.f32 %v3072_v15, %v3795_v12 }
 0x2aa   : > { %v1443_v19 = vadd.f32 %v3090_v17, %v3795_v12  ;;  %v1196_v20 = vpop.f32.mrf.mxu0  ;;  %v1434_v22 = vpop.f32.mrf.mxu1 }
 0x2ab   : > { %1296 = vst.msk [vmem:[%s3802_s9 + $0xa0] sm:$0xf] %vm811_vm2, %v2863_v9  ;;  %1534 = vst.msk [vmem:[%s3802_s9 + $0xe0] sm:$0xf] %vm811_vm2, %v2879_v18  ;;  %v2866_v23 = vpack.c.bf16 %v1205_v39, %v1205_v39  ;;  %v1197_v25 = vadd.f32 %v3795_v12, %v1196_v20  ;;  %v1435_v26 = vadd.f32 %v3795_v12, %v1434_v22 }
 0x2ac   : > { %v2882_v24 = vpack.c.bf16 %v1443_v19, %v1443_v19  ;;  %v3075_v40 = vpop.f32.mrf.mxu0  ;;  %v3093_v28 = vpop.f32.mrf.mxu1 }
 0x2ad   : > { %1299 = vst.msk [vmem:[%s3802_s9 + $0xac] sm:$0xf] %vm811_vm2, %v2866_v23  ;;  %v2864_v10 = vpack.c.bf16 %v1197_v25, %v1197_v25  ;;  %v2880_v29 = vpack.c.bf16 %v1435_v26, %v1435_v26  ;;  %v1218_v30 = vadd.f32 %v3075_v40, %v3795_v12  ;;  %v1456_v41 = vadd.f32 %v3093_v28, %v3795_v12 }
 0x2ae   : > { %1537 = vst.msk [vmem:[%s3802_s9 + $0xec] sm:$0xf] %vm811_vm2, %v2882_v24  ;;  %v1209_v31 = vpop.f32.mrf.mxu0  ;;  %v1447_v32 = vpop.f32.mrf.mxu1 }
 0x2af   : > { %1297 = vst.msk [vmem:[%s3802_s9 + $0xa4] sm:$0xf] %vm811_vm2, %v2864_v10  ;;  %1535 = vst.msk [vmem:[%s3802_s9 + $0xe4] sm:$0xf] %vm811_vm2, %v2880_v29  ;;  %v2869_v56 = vpack.c.bf16 %v1218_v30, %v1218_v30  ;;  %v2885_v34 = vpack.c.bf16 %v1456_v41, %v1456_v41  ;;  %v1210_v38 = vadd.f32 %v3795_v12, %v1209_v31 }
 0x2b0   : > { %v1448_v27 = vadd.f32 %v3795_v12, %v1447_v32  ;;  %v3076_v36 = vpop.f32.mrf.mxu0  ;;  %v3094_v57 = vpop.f32.mrf.mxu1 }
 0x2b1   : > { %1302 = vst.msk [vmem:[%s3802_s9 + $0xb8] sm:$0xf] %vm811_vm2, %v2869_v56  ;;  %1540 = vst.msk [vmem:[%s3802_s9 + $0xf8] sm:$0xf] %vm811_vm2, %v2885_v34  ;;  %v2867_v50 = vpack.c.bf16 %v1210_v38, %v1210_v38  ;;  %v1221_v45 = vadd.f32 %v3076_v36, %v3795_v12  ;;  %v1459_v48 = vadd.f32 %v3094_v57, %v3795_v12 }
 0x2b2   : > { %v2883_v44 = vpack.c.bf16 %v1448_v27, %v1448_v27  ;;  %v1212_v49 = vpop.f32.mrf.mxu0  ;;  %v1450_v51 = vpop.f32.mrf.mxu1 }
 0x2b3   : > { %1300 = vst.msk [vmem:[%s3802_s9 + $0xb0] sm:$0xf] %vm811_vm2, %v2867_v50  ;;  %v2870_v52 = vpack.c.bf16 %v1221_v45, %v1221_v45  ;;  %v2886_v53 = vpack.c.bf16 %v1459_v48, %v1459_v48  ;;  %v1213_v54 = vadd.f32 %v3795_v12, %v1212_v49  ;;  %v1451_v21 = vadd.f32 %v3795_v12, %v1450_v51 }
 0x2b4   : > { %1538 = vst.msk [vmem:[%s3802_s9 + $0xf0] sm:$0xf] %vm811_vm2, %v2883_v44  ;;  %v3099_v14 = vpop.f32.mrf.mxu0  ;;  %v3117_v35 = vpop.f32.mrf.mxu1 }
 0x2b5   : > { %1303 = vst.msk [vmem:[%s3802_s9 + $0xbc] sm:$0xf] %vm811_vm2, %v2870_v52  ;;  %1541 = vst.msk [vmem:[%s3802_s9 + $0xfc] sm:$0xf] %vm811_vm2, %v2886_v53  ;;  %v2868_v55 = vpack.c.bf16 %v1213_v54, %v1213_v54  ;;  %v2884_v58 = vpack.c.bf16 %v1451_v21, %v1451_v21  ;;  %v1646_v59 = vadd.f32 %v3099_v14, %v3795_v12 }
 0x2b6   : > { %v1884_v42 = vadd.f32 %v3117_v35, %v3795_v12  ;;  %v1637_v60 = vpop.f32.mrf.mxu0  ;;  %v1875_v61 = vpop.f32.mrf.mxu1 }
 0x2b7   : > { %1301 = vst.msk [vmem:[%s3802_s9 + $0xb4] sm:$0xf] %vm811_vm2, %v2868_v55  ;;  %1539 = vst.msk [vmem:[%s3802_s9 + $0xf4] sm:$0xf] %vm811_vm2, %v2884_v58  ;;  %v2889_v46 = vpack.c.bf16 %v1646_v59, %v1646_v59  ;;  %v1638_v63 = vadd.f32 %v3795_v12, %v1637_v60  ;;  %v1876_v0 = vadd.f32 %v3795_v12, %v1875_v61 }
 0x2b8   : > { %v2905_v62 = vpack.c.bf16 %v1884_v42, %v1884_v42  ;;  %v3100_v1 = vpop.f32.mrf.mxu0  ;;  %v3118_v47 = vpop.f32.mrf.mxu1 }
 0x2b9   : > { %1766 = vst.msk [vmem:[%s3802_s9 + $0x108] sm:$0xf] %vm811_vm2, %v2889_v46  ;;  %v2887_v33 = vpack.c.bf16 %v1638_v63, %v1638_v63  ;;  %v2903_v2 = vpack.c.bf16 %v1876_v0, %v1876_v0  ;;  %v1649_v3 = vadd.f32 %v3100_v1, %v3795_v12  ;;  %v1887_v37 = vadd.f32 %v3118_v47, %v3795_v12 }
 0x2ba   : > { %2004 = vst.msk [vmem:[%s3802_s9 + $0x148] sm:$0xf] %vm811_vm2, %v2905_v62  ;;  %v1640_v43 = vpop.f32.mrf.mxu0  ;;  %v1878_v4 = vpop.f32.mrf.mxu1 }
 0x2bb   : > { %1764 = vst.msk [vmem:[%s3802_s9 + $0x100] sm:$0xf] %vm811_vm2, %v2887_v33  ;;  %2002 = vst.msk [vmem:[%s3802_s9 + $0x140] sm:$0xf] %vm811_vm2, %v2903_v2  ;;  %v2890_v6 = vpack.c.bf16 %v1649_v3, %v1649_v3  ;;  %v2906_v16 = vpack.c.bf16 %v1887_v37, %v1887_v37  ;;  %v1641_v13 = vadd.f32 %v3795_v12, %v1640_v43 }
 0x2bc   : > { %v1879_v7 = vadd.f32 %v3795_v12, %v1878_v4  ;;  %v3103_v8 = vpop.f32.mrf.mxu0  ;;  %v3121_v11 = vpop.f32.mrf.mxu1 }
 0x2bd   : > { %1767 = vst.msk [vmem:[%s3802_s9 + $0x10c] sm:$0xf] %vm811_vm2, %v2890_v6  ;;  %2005 = vst.msk [vmem:[%s3802_s9 + $0x14c] sm:$0xf] %vm811_vm2, %v2906_v16  ;;  %v2888_v5 = vpack.c.bf16 %v1641_v13, %v1641_v13  ;;  %v1662_v17 = vadd.f32 %v3103_v8, %v3795_v12  ;;  %v1900_v9 = vadd.f32 %v3121_v11, %v3795_v12 }
 0x2be   : > { %v2904_v15 = vpack.c.bf16 %v1879_v7, %v1879_v7  ;;  %v1653_v18 = vpop.f32.mrf.mxu0  ;;  %v1891_v39 = vpop.f32.mrf.mxu1 }
 0x2bf   : > { %1765 = vst.msk [vmem:[%s3802_s9 + $0x104] sm:$0xf] %vm811_vm2, %v2888_v5  ;;  %v2893_v19 = vpack.c.bf16 %v1662_v17, %v1662_v17  ;;  %v2909_v20 = vpack.c.bf16 %v1900_v9, %v1900_v9  ;;  %v1654_v22 = vadd.f32 %v3795_v12, %v1653_v18  ;;  %v1892_v23 = vadd.f32 %v3795_v12, %v1891_v39 }
 0x2c0   : > { %2003 = vst.msk [vmem:[%s3802_s9 + $0x144] sm:$0xf] %vm811_vm2, %v2904_v15  ;;  %v3104_v24 = vpop.f32.mrf.mxu0  ;;  %v3122_v25 = vpop.f32.mrf.mxu1 }
 0x2c1   : > { %1770 = vst.msk [vmem:[%s3802_s9 + $0x118] sm:$0xf] %vm811_vm2, %v2893_v19  ;;  %2008 = vst.msk [vmem:[%s3802_s9 + $0x158] sm:$0xf] %vm811_vm2, %v2909_v20  ;;  %v2891_v26 = vpack.c.bf16 %v1654_v22, %v1654_v22  ;;  %v2907_v40 = vpack.c.bf16 %v1892_v23, %v1892_v23  ;;  %v1665_v28 = vadd.f32 %v3104_v24, %v3795_v12 }
 0x2c2   : > { %v1903_v10 = vadd.f32 %v3122_v25, %v3795_v12  ;;  %v1656_v29 = vpop.f32.mrf.mxu0  ;;  %v1894_v30 = vpop.f32.mrf.mxu1 }
 0x2c3   : > { %1768 = vst.msk [vmem:[%s3802_s9 + $0x110] sm:$0xf] %vm811_vm2, %v2891_v26  ;;  %2006 = vst.msk [vmem:[%s3802_s9 + $0x150] sm:$0xf] %vm811_vm2, %v2907_v40  ;;  %v2894_v41 = vpack.c.bf16 %v1665_v28, %v1665_v28  ;;  %v1657_v32 = vadd.f32 %v3795_v12, %v1656_v29  ;;  %v1895_v56 = vadd.f32 %v3795_v12, %v1894_v30 }
 0x2c4   : > { %v2910_v31 = vpack.c.bf16 %v1903_v10, %v1903_v10  ;;  %v3107_v34 = vpop.f32.mrf.mxu0  ;;  %v3125_v38 = vpop.f32.mrf.mxu1 }
 0x2c5   : > { %1771 = vst.msk [vmem:[%s3802_s9 + $0x11c] sm:$0xf] %vm811_vm2, %v2894_v41  ;;  %v2892_v27 = vpack.c.bf16 %v1657_v32, %v1657_v32  ;;  %v2908_v36 = vpack.c.bf16 %v1895_v56, %v1895_v56  ;;  %v1678_v57 = vadd.f32 %v3107_v34, %v3795_v12  ;;  %v1916_v50 = vadd.f32 %v3125_v38, %v3795_v12 }
 0x2c6   : > { %2009 = vst.msk [vmem:[%s3802_s9 + $0x15c] sm:$0xf] %vm811_vm2, %v2910_v31  ;;  %v1669_v44 = vpop.f32.mrf.mxu0  ;;  %v1907_v45 = vpop.f32.mrf.mxu1 }
 0x2c7   : > { %1769 = vst.msk [vmem:[%s3802_s9 + $0x114] sm:$0xf] %vm811_vm2, %v2892_v27  ;;  %2007 = vst.msk [vmem:[%s3802_s9 + $0x154] sm:$0xf] %vm811_vm2, %v2908_v36  ;;  %v2897_v48 = vpack.c.bf16 %v1678_v57, %v1678_v57  ;;  %v2913_v49 = vpack.c.bf16 %v1916_v50, %v1916_v50  ;;  %v1670_v51 = vadd.f32 %v3795_v12, %v1669_v44 }
 0x2c8   : > { %v1908_v52 = vadd.f32 %v3795_v12, %v1907_v45  ;;  %v3108_v53 = vpop.f32.mrf.mxu0  ;;  %v3126_v54 = vpop.f32.mrf.mxu1 }
 0x2c9   : > { %1774 = vst.msk [vmem:[%s3802_s9 + $0x128] sm:$0xf] %vm811_vm2, %v2897_v48  ;;  %2012 = vst.msk [vmem:[%s3802_s9 + $0x168] sm:$0xf] %vm811_vm2, %v2913_v49  ;;  %v2895_v21 = vpack.c.bf16 %v1670_v51, %v1670_v51  ;;  %v1681_v35 = vadd.f32 %v3108_v53, %v3795_v12  ;;  %v1919_v55 = vadd.f32 %v3126_v54, %v3795_v12 }
 0x2ca   : > { %v2911_v14 = vpack.c.bf16 %v1908_v52, %v1908_v52  ;;  %v1672_v58 = vpop.f32.mrf.mxu0  ;;  %v1910_v59 = vpop.f32.mrf.mxu1 }
 0x2cb   : > { %1772 = vst.msk [vmem:[%s3802_s9 + $0x120] sm:$0xf] %vm811_vm2, %v2895_v21  ;;  %v2898_v42 = vpack.c.bf16 %v1681_v35, %v1681_v35  ;;  %v2914_v60 = vpack.c.bf16 %v1919_v55, %v1919_v55  ;;  %v1673_v61 = vadd.f32 %v3795_v12, %v1672_v58  ;;  %v1911_v46 = vadd.f32 %v3795_v12, %v1910_v59 }
 0x2cc   : > { %2010 = vst.msk [vmem:[%s3802_s9 + $0x160] sm:$0xf] %vm811_vm2, %v2911_v14  ;;  %v3111_v62 = vpop.f32.mrf.mxu0  ;;  %v3129_v63 = vpop.f32.mrf.mxu1 }
 0x2cd   : > { %1775 = vst.msk [vmem:[%s3802_s9 + $0x12c] sm:$0xf] %vm811_vm2, %v2898_v42  ;;  %2013 = vst.msk [vmem:[%s3802_s9 + $0x16c] sm:$0xf] %vm811_vm2, %v2914_v60  ;;  %v2896_v0 = vpack.c.bf16 %v1673_v61, %v1673_v61  ;;  %v2912_v1 = vpack.c.bf16 %v1911_v46, %v1911_v46  ;;  %v1694_v47 = vadd.f32 %v3111_v62, %v3795_v12 }
 0x2ce   : > { %v1932_v33 = vadd.f32 %v3129_v63, %v3795_v12  ;;  %v1685_v2 = vpop.f32.mrf.mxu0  ;;  %v1923_v3 = vpop.f32.mrf.mxu1 }
 0x2cf   : > { %1773 = vst.msk [vmem:[%s3802_s9 + $0x124] sm:$0xf] %vm811_vm2, %v2896_v0  ;;  %2011 = vst.msk [vmem:[%s3802_s9 + $0x164] sm:$0xf] %vm811_vm2, %v2912_v1  ;;  %v2901_v37 = vpack.c.bf16 %v1694_v47, %v1694_v47  ;;  %v1686_v4 = vadd.f32 %v3795_v12, %v1685_v2  ;;  %v1924_v6 = vadd.f32 %v3795_v12, %v1923_v3 }
 0x2d0   : > { %v2917_v43 = vpack.c.bf16 %v1932_v33, %v1932_v33  ;;  %v3112_v16 = vpop.f32.mrf.mxu0  ;;  %v3130_v13 = vpop.f32.mrf.mxu1 }
 0x2d1   : > { %1778 = vst.msk [vmem:[%s3802_s9 + $0x138] sm:$0xf] %vm811_vm2, %v2901_v37  ;;  %v2899_v7 = vpack.c.bf16 %v1686_v4, %v1686_v4  ;;  %v2915_v8 = vpack.c.bf16 %v1924_v6, %v1924_v6  ;;  %v1697_v11 = vadd.f32 %v3112_v16, %v3795_v12  ;;  %v1935_v5 = vadd.f32 %v3130_v13, %v3795_v12 }
 0x2d2   : > { %2016 = vst.msk [vmem:[%s3802_s9 + $0x178] sm:$0xf] %vm811_vm2, %v2917_v43  ;;  %v1688_v15 = vpop.f32.mrf.mxu0  ;;  %v1926_v17 = vpop.f32.mrf.mxu1 }
 0x2d3   : > { %1776 = vst.msk [vmem:[%s3802_s9 + $0x130] sm:$0xf] %vm811_vm2, %v2899_v7  ;;  %2014 = vst.msk [vmem:[%s3802_s9 + $0x170] sm:$0xf] %vm811_vm2, %v2915_v8  ;;  %v2902_v9 = vpack.c.bf16 %v1697_v11, %v1697_v11  ;;  %v2918_v18 = vpack.c.bf16 %v1935_v5, %v1935_v5  ;;  %v1689_v39 = vadd.f32 %v3795_v12, %v1688_v15 }
 0x2d4   : > { %v1927_v19 = vadd.f32 %v3795_v12, %v1926_v17  ;;  %v3135_v20 = vpop.f32.mrf.mxu0  ;;  %v3153_v22 = vpop.f32.mrf.mxu1 }
 0x2d5   : > { %1779 = vst.msk [vmem:[%s3802_s9 + $0x13c] sm:$0xf] %vm811_vm2, %v2902_v9  ;;  %2017 = vst.msk [vmem:[%s3802_s9 + $0x17c] sm:$0xf] %vm811_vm2, %v2918_v18  ;;  %v2900_v23 = vpack.c.bf16 %v1689_v39, %v1689_v39  ;;  %v2122_v25 = vadd.f32 %v3135_v20, %v3795_v12  ;;  %v2360_v26 = vadd.f32 %v3153_v22, %v3795_v12 }
 0x2d6   : > { %v2916_v24 = vpack.c.bf16 %v1927_v19, %v1927_v19  ;;  %v2113_v40 = vpop.f32.mrf.mxu0  ;;  %v2351_v28 = vpop.f32.mrf.mxu1 }
 0x2d7   : > { %1777 = vst.msk [vmem:[%s3802_s9 + $0x134] sm:$0xf] %vm811_vm2, %v2900_v23  ;;  %v2921_v10 = vpack.c.bf16 %v2122_v25, %v2122_v25  ;;  %v2937_v29 = vpack.c.bf16 %v2360_v26, %v2360_v26  ;;  %v2114_v30 = vadd.f32 %v3795_v12, %v2113_v40  ;;  %v2352_v41 = vadd.f32 %v3795_v12, %v2351_v28 }
 0x2d8   : > { %2015 = vst.msk [vmem:[%s3802_s9 + $0x174] sm:$0xf] %vm811_vm2, %v2916_v24  ;;  %v3136_v31 = vpop.f32.mrf.mxu0  ;;  %v3154_v32 = vpop.f32.mrf.mxu1 }
 0x2d9   : > { %2242 = vst.msk [vmem:[%s3802_s9 + $0x188] sm:$0xf] %vm811_vm2, %v2921_v10  ;;  %2480 = vst.msk [vmem:[%s3802_s9 + $0x1c8] sm:$0xf] %vm811_vm2, %v2937_v29  ;;  %v2919_v56 = vpack.c.bf16 %v2114_v30, %v2114_v30  ;;  %v2935_v34 = vpack.c.bf16 %v2352_v41, %v2352_v41  ;;  %v2125_v38 = vadd.f32 %v3136_v31, %v3795_v12 }
 0x2da   : > { %v2363_v27 = vadd.f32 %v3154_v32, %v3795_v12  ;;  %v2116_v36 = vpop.f32.mrf.mxu0  ;;  %v2354_v57 = vpop.f32.mrf.mxu1 }
 0x2db   : > { %2240 = vst.msk [vmem:[%s3802_s9 + $0x180] sm:$0xf] %vm811_vm2, %v2919_v56  ;;  %2478 = vst.msk [vmem:[%s3802_s9 + $0x1c0] sm:$0xf] %vm811_vm2, %v2935_v34  ;;  %v2922_v50 = vpack.c.bf16 %v2125_v38, %v2125_v38  ;;  %v2117_v45 = vadd.f32 %v3795_v12, %v2116_v36  ;;  %v2355_v48 = vadd.f32 %v3795_v12, %v2354_v57 }
 0x2dc   : > { %v2938_v44 = vpack.c.bf16 %v2363_v27, %v2363_v27  ;;  %v3139_v49 = vpop.f32.mrf.mxu0  ;;  %v3157_v51 = vpop.f32.mrf.mxu1 }
 0x2dd   : > { %2243 = vst.msk [vmem:[%s3802_s9 + $0x18c] sm:$0xf] %vm811_vm2, %v2922_v50  ;;  %v2920_v52 = vpack.c.bf16 %v2117_v45, %v2117_v45  ;;  %v2936_v53 = vpack.c.bf16 %v2355_v48, %v2355_v48  ;;  %v2138_v54 = vadd.f32 %v3139_v49, %v3795_v12  ;;  %v2376_v21 = vadd.f32 %v3157_v51, %v3795_v12 }
 0x2de   : > { %2481 = vst.msk [vmem:[%s3802_s9 + $0x1cc] sm:$0xf] %vm811_vm2, %v2938_v44  ;;  %v2129_v14 = vpop.f32.mrf.mxu0  ;;  %v2367_v35 = vpop.f32.mrf.mxu1 }
 0x2df   : > { %2241 = vst.msk [vmem:[%s3802_s9 + $0x184] sm:$0xf] %vm811_vm2, %v2920_v52  ;;  %2479 = vst.msk [vmem:[%s3802_s9 + $0x1c4] sm:$0xf] %vm811_vm2, %v2936_v53  ;;  %v2925_v55 = vpack.c.bf16 %v2138_v54, %v2138_v54  ;;  %v2941_v58 = vpack.c.bf16 %v2376_v21, %v2376_v21  ;;  %v2130_v59 = vadd.f32 %v3795_v12, %v2129_v14 }
 0x2e0   : > { %v2368_v42 = vadd.f32 %v3795_v12, %v2367_v35  ;;  %v3140_v60 = vpop.f32.mrf.mxu0  ;;  %v3158_v61 = vpop.f32.mrf.mxu1 }
 0x2e1   : > { %2246 = vst.msk [vmem:[%s3802_s9 + $0x198] sm:$0xf] %vm811_vm2, %v2925_v55  ;;  %2484 = vst.msk [vmem:[%s3802_s9 + $0x1d8] sm:$0xf] %vm811_vm2, %v2941_v58  ;;  %v2923_v46 = vpack.c.bf16 %v2130_v59, %v2130_v59  ;;  %v2141_v63 = vadd.f32 %v3140_v60, %v3795_v12  ;;  %v2379_v0 = vadd.f32 %v3158_v61, %v3795_v12 }
 0x2e2   : > { %v2939_v62 = vpack.c.bf16 %v2368_v42, %v2368_v42  ;;  %v2132_v1 = vpop.f32.mrf.mxu0  ;;  %v2370_v47 = vpop.f32.mrf.mxu1 }
 0x2e3   : > { %2244 = vst.msk [vmem:[%s3802_s9 + $0x190] sm:$0xf] %vm811_vm2, %v2923_v46  ;;  %v2926_v33 = vpack.c.bf16 %v2141_v63, %v2141_v63  ;;  %v2942_v2 = vpack.c.bf16 %v2379_v0, %v2379_v0  ;;  %v2133_v3 = vadd.f32 %v3795_v12, %v2132_v1  ;;  %v2371_v37 = vadd.f32 %v3795_v12, %v2370_v47 }
 0x2e4   : > { %2482 = vst.msk [vmem:[%s3802_s9 + $0x1d0] sm:$0xf] %vm811_vm2, %v2939_v62  ;;  %v3143_v43 = vpop.f32.mrf.mxu0  ;;  %v3161_v4 = vpop.f32.mrf.mxu1 }
 0x2e5   : > { %2247 = vst.msk [vmem:[%s3802_s9 + $0x19c] sm:$0xf] %vm811_vm2, %v2926_v33  ;;  %2485 = vst.msk [vmem:[%s3802_s9 + $0x1dc] sm:$0xf] %vm811_vm2, %v2942_v2  ;;  %v2924_v6 = vpack.c.bf16 %v2133_v3, %v2133_v3  ;;  %v2940_v16 = vpack.c.bf16 %v2371_v37, %v2371_v37  ;;  %v2154_v13 = vadd.f32 %v3143_v43, %v3795_v12 }
 0x2e6   : > { %v2392_v7 = vadd.f32 %v3161_v4, %v3795_v12  ;;  %v2145_v8 = vpop.f32.mrf.mxu0  ;;  %v2383_v11 = vpop.f32.mrf.mxu1 }
 0x2e7   : > { %2245 = vst.msk [vmem:[%s3802_s9 + $0x194] sm:$0xf] %vm811_vm2, %v2924_v6  ;;  %2483 = vst.msk [vmem:[%s3802_s9 + $0x1d4] sm:$0xf] %vm811_vm2, %v2940_v16  ;;  %v2929_v5 = vpack.c.bf16 %v2154_v13, %v2154_v13  ;;  %v2146_v17 = vadd.f32 %v3795_v12, %v2145_v8  ;;  %v2384_v9 = vadd.f32 %v3795_v12, %v2383_v11 }
 0x2e8   : > { %v2945_v15 = vpack.c.bf16 %v2392_v7, %v2392_v7  ;;  %v3144_v18 = vpop.f32.mrf.mxu0  ;;  %v3162_v39 = vpop.f32.mrf.mxu1 }
 0x2e9   : > { %2250 = vst.msk [vmem:[%s3802_s9 + $0x1a8] sm:$0xf] %vm811_vm2, %v2929_v5  ;;  %v2927_v19 = vpack.c.bf16 %v2146_v17, %v2146_v17  ;;  %v2943_v20 = vpack.c.bf16 %v2384_v9, %v2384_v9  ;;  %v2157_v22 = vadd.f32 %v3144_v18, %v3795_v12  ;;  %v2395_v23 = vadd.f32 %v3162_v39, %v3795_v12 }
 0x2ea   : > { %2488 = vst.msk [vmem:[%s3802_s9 + $0x1e8] sm:$0xf] %vm811_vm2, %v2945_v15  ;;  %v2148_v24 = vpop.f32.mrf.mxu0  ;;  %v2386_v25 = vpop.f32.mrf.mxu1 }
 0x2eb   : > { %2248 = vst.msk [vmem:[%s3802_s9 + $0x1a0] sm:$0xf] %vm811_vm2, %v2927_v19  ;;  %2486 = vst.msk [vmem:[%s3802_s9 + $0x1e0] sm:$0xf] %vm811_vm2, %v2943_v20  ;;  %v2930_v26 = vpack.c.bf16 %v2157_v22, %v2157_v22  ;;  %v2946_v40 = vpack.c.bf16 %v2395_v23, %v2395_v23  ;;  %v2149_v28 = vadd.f32 %v3795_v12, %v2148_v24 }
 0x2ec   : > { %v2387_v10 = vadd.f32 %v3795_v12, %v2386_v25  ;;  %v3147_v29 = vpop.f32.mrf.mxu0  ;;  %v3165_v30 = vpop.f32.mrf.mxu1 }
 0x2ed   : > { %2251 = vst.msk [vmem:[%s3802_s9 + $0x1ac] sm:$0xf] %vm811_vm2, %v2930_v26  ;;  %2489 = vst.msk [vmem:[%s3802_s9 + $0x1ec] sm:$0xf] %vm811_vm2, %v2946_v40  ;;  %v2928_v41 = vpack.c.bf16 %v2149_v28, %v2149_v28  ;;  %v2170_v32 = vadd.f32 %v3147_v29, %v3795_v12  ;;  %v2408_v56 = vadd.f32 %v3165_v30, %v3795_v12 }
 0x2ee   : > { %v2944_v31 = vpack.c.bf16 %v2387_v10, %v2387_v10  ;;  %v2161_v34 = vpop.f32.mrf.mxu0  ;;  %v2399_v38 = vpop.f32.mrf.mxu1 }
 0x2ef   : > { %2249 = vst.msk [vmem:[%s3802_s9 + $0x1a4] sm:$0xf] %vm811_vm2, %v2928_v41  ;;  %v2933_v27 = vpack.c.bf16 %v2170_v32, %v2170_v32  ;;  %v2949_v36 = vpack.c.bf16 %v2408_v56, %v2408_v56  ;;  %v2162_v57 = vadd.f32 %v3795_v12, %v2161_v34  ;;  %v2400_v50 = vadd.f32 %v3795_v12, %v2399_v38 }
 0x2f0   : > { %2487 = vst.msk [vmem:[%s3802_s9 + $0x1e4] sm:$0xf] %vm811_vm2, %v2944_v31  ;;  %v3148_v44 = vpop.f32.mrf.mxu0  ;;  %v3166_v45 = vpop.f32.mrf.mxu1 }
 0x2f1   : > { %2254 = vst.msk [vmem:[%s3802_s9 + $0x1b8] sm:$0xf] %vm811_vm2, %v2933_v27  ;;  %2492 = vst.msk [vmem:[%s3802_s9 + $0x1f8] sm:$0xf] %vm811_vm2, %v2949_v36  ;;  %v2931_v48 = vpack.c.bf16 %v2162_v57, %v2162_v57  ;;  %v2947_v49 = vpack.c.bf16 %v2400_v50, %v2400_v50  ;;  %v2173_v51 = vadd.f32 %v3148_v44, %v3795_v12 }
 0x2f2   : > { %v2411_v52 = vadd.f32 %v3166_v45, %v3795_v12  ;;  %v2164_v53 = vpop.f32.mrf.mxu0  ;;  %v2402_v54 = vpop.f32.mrf.mxu1 }
 0x2f3   : > { %2252 = vst.msk [vmem:[%s3802_s9 + $0x1b0] sm:$0xf] %vm811_vm2, %v2931_v48  ;;  %2490 = vst.msk [vmem:[%s3802_s9 + $0x1f0] sm:$0xf] %vm811_vm2, %v2947_v49  ;;  %v2934_v21 = vpack.c.bf16 %v2173_v51, %v2173_v51  ;;  %v2165_v35 = vadd.f32 %v3795_v12, %v2164_v53  ;;  %v2403_v55 = vadd.f32 %v3795_v12, %v2402_v54 }
 0x2f4   : > { %v2950_v14 = vpack.c.bf16 %v2411_v52, %v2411_v52 }
 0x2f5   : > { %2255 = vst.msk [vmem:[%s3802_s9 + $0x1bc] sm:$0xf] %vm811_vm2, %v2934_v21  ;;  %v2932_v58 = vpack.c.bf16 %v2165_v35, %v2165_v35  ;;  %v2948_v59 = vpack.c.bf16 %v2403_v55, %v2403_v55 }
 0x2f6   : > { %2493 = vst.msk [vmem:[%s3802_s9 + $0x1fc] sm:$0xf] %vm811_vm2, %v2950_v14 }
 0x2f7   : > { %2253 = vst.msk [vmem:[%s3802_s9 + $0x1b4] sm:$0xf] %vm811_vm2, %v2932_v58  ;;  %2491 = vst.msk [vmem:[%s3802_s9 + $0x1f4] sm:$0xf] %vm811_vm2, %v2948_v59 }
 0x2f8 PF: > { %s21_s27 = sadd.s32 1, %s3400_s27  }
 0x2f9   : > { %p18_p4 = scmp.ge.s32.totalorder %s21_s27, 18  }
 0x2fb   :  { %20 = sbr.rel (!%p18_p4) target bundleno = 3 (0x3), region = 102 }
 0x300   :  { %2516 = vsyncpa [#allocation3], 1 }
 0x301   :  { %2518 = vsyncpa [#allocation3 + $0x1], 1 }
 0x302   :  { %2519 = vsyncpa [#allocation5], 1 }
 0x303   :  { %2520 = vsyncpa [#allocation8], 1 }

</bundles_post_ra>
